<compile_context>
chip_gen: v6e
topology: v6e:2x2x1
jax: 0.10.0
libtpu: 0.0.40
codegen_flags: <defaults>
</compile_context>

<pallas_src>
import math

import jax
import jax.numpy as jnp
import numpy as np
from jax.experimental import pallas as pl
from jax.experimental.pallas import tpu as pltpu


def _mhfa_kernel(x_ref,                         # VMEM (BT, TT, LD)
                 Wv_ref, bv_ref,                # (LD, C), (1, C)  -- fused value weights
                 Wa_ref, ba_ref,                # (LD, H), (1, H)  -- fused attention weights
                 Wf_ref, bf_ref,                # (H, C, O), (1, O)
                 out_ref,                       # (BT, O)
                 m_sc, l_sc, acc_sc):           # (BT,H), (BT,H), (BT,H,C) f32
    ti = pl.program_id(1)
    nt = pl.num_programs(1)

    BT, TT, LD = x_ref.shape
    C = Wv_ref.shape[1]
    H = Wa_ref.shape[1]
    O = Wf_ref.shape[2]

    @pl.when(ti == 0)
    def _():
        m_sc[...] = jnp.full_like(m_sc, -jnp.inf)
        l_sc[...] = jnp.zeros_like(l_sc)
        acc_sc[...] = jnp.zeros_like(acc_sc)

    # ---- fused (layer-mix + compression + attention-head) matmuls on MXU ----
    M = BT * TT
    x2 = x_ref[...].reshape(M, LD)              # merge leading dims, lanes unchanged

    att = jnp.dot(x2, Wa_ref[...], preferred_element_type=jnp.float32) + ba_ref[...]
    v = jnp.dot(x2, Wv_ref[...], preferred_element_type=jnp.float32) + bv_ref[...]

    s = att.reshape(BT, TT, H)                  # logits over this time tile
    v3 = v.reshape(BT, TT, C)

    # ---- streaming softmax over time + attentive pooling (online max/sum) ----
    m_prev = m_sc[...]                                      # (BT, H)
    m_new = jnp.maximum(m_prev, jnp.max(s, axis=1))         # (BT, H)
    alpha = jnp.exp(m_prev - m_new)                         # (BT, H)
    p = jnp.exp(s - m_new[:, None, :])                      # (BT, TT, H)
    l_sc[...] = alpha * l_sc[...] + jnp.sum(p, axis=1)
    acc_sc[...] = alpha[:, :, None] * acc_sc[...] + jnp.einsum(
        'bth,btc->bhc', p, v3, preferred_element_type=jnp.float32)
    m_sc[...] = m_new

    @pl.when(ti == nt - 1)
    def _():
        pooled = acc_sc[...] / l_sc[...][:, :, None]        # (BT, H, C)
        # final FC without flattening pooled: out = sum_h pooled[:,h,:] @ Wf[h]
        out = jnp.zeros((BT, O), jnp.float32)
        for h in range(H):
            out = out + jnp.dot(pooled[:, h, :], Wf_ref[h],
                                preferred_element_type=jnp.float32)
        out_ref[...] = out + bf_ref[...]


def _pick_tile(n, cap):
    t = min(n, cap)
    while n % t:
        t -= 1
    return t


def mhfa_top_pallas(x_bdtl, params, *, b_tile=None, t_tile=None):
    """x_bdtl: (B, D_in, T, L) float32, matching the PyTorch forward's input."""
    B, D, T, L = x_bdtl.shape
    Wk = params['Wk']; bk = params['bk']
    Wv = params['Wv']; bv = params['bv']
    Wa = params['Wa']; ba = params['ba']
    Wf = params['Wf']; bf = params['bf']
    C = Wk.shape[1]
    H = Wa.shape[1]
    O = Wf.shape[1]
    LD = L * D

    if b_tile is None:
        b_tile = _pick_tile(B, 8)
    if t_tile is None:
        t_tile = _pick_tile(T, 128)
    assert B % b_tile == 0 and T % t_tile == 0

    # Lane-dense kernel layout: (B, T, L*D) — fused feature axis on lanes,
    # time on sublanes.
    # TODO(synk): if the upstream producer can emit (B, T, L, D) directly, drop this transpose.
    x2 = jnp.transpose(x_bdtl, (0, 2, 3, 1)).reshape(B, T, LD)

    # Fold softmax(layer weights), the k/v compressions and the attention head
    # into two weight matrices (pure linear algebra, identical forward semantics).
    sm_k = jax.nn.softmax(params['weights_k'])              # (L,)
    sm_v = jax.nn.softmax(params['weights_v'])              # (L,)
    Wa_mix = (sm_k[:, None, None] * (Wk @ Wa)[None]).reshape(LD, H)
    Wv_mix = (sm_v[:, None, None] * Wv[None]).reshape(LD, C)
    ba_mix = (bk @ Wa + ba).reshape(1, H)
    bv2 = bv.reshape(1, C)
    Wf3 = Wf.reshape(H, C, O)      # avoids in-kernel (H, C) -> (H*C) relayout
    bf2 = bf.reshape(1, O)

    nb = B // b_tile
    nt = T // t_tile

    out = pl.pallas_call(
        _mhfa_kernel,
        out_shape=jax.ShapeDtypeStruct((B, O), jnp.float32),
        grid_spec=pltpu.PrefetchScalarGridSpec(
            num_scalar_prefetch=0,
            grid=(nb, nt),
            in_specs=[
                pl.BlockSpec((b_tile, t_tile, LD),
                             lambda bi, ti: (bi, ti, 0)),                # x
                pl.BlockSpec((LD, C), lambda bi, ti: (0, 0)),            # Wv_mix
                pl.BlockSpec((1, C), lambda bi, ti: (0, 0)),             # bv
                pl.BlockSpec((LD, H), lambda bi, ti: (0, 0)),            # Wa_mix
                pl.BlockSpec((1, H), lambda bi, ti: (0, 0)),             # ba_mix
                pl.BlockSpec((H, C, O), lambda bi, ti: (0, 0, 0)),       # Wf (H, C, O)
                pl.BlockSpec((1, O), lambda bi, ti: (0, 0)),             # bf
            ],
            out_specs=pl.BlockSpec((b_tile, O), lambda bi, ti: (bi, 0)),
            scratch_shapes=[
                pltpu.VMEM((b_tile, H), jnp.float32),      # running max
                pltpu.VMEM((b_tile, H), jnp.float32),      # running sum
                pltpu.VMEM((b_tile, H, C), jnp.float32),   # running pooled acc
            ]),
        compiler_params=pltpu.CompilerParams(
            dimension_semantics=("parallel", "arbitrary")),
    )(x2, Wv_mix, bv2, Wa_mix, ba_mix, Wf3, bf2)
    return out


def mhfa_top_ref(x_bdtl, params):
    """Pure-JAX reference mirroring the PyTorch forward exactly."""
    B = x_bdtl.shape[0]
    wk = jax.nn.softmax(params['weights_k'])
    wv = jax.nn.softmax(params['weights_v'])
    k = jnp.sum(x_bdtl * wk, axis=-1).transpose(0, 2, 1)      # (B, T, D)
    v = jnp.sum(x_bdtl * wv, axis=-1).transpose(0, 2, 1)      # (B, T, D)
    k = k @ params['Wk'] + params['bk']                       # (B, T, C)
    v = v @ params['Wv'] + params['bv']                       # (B, T, C)
    att = k @ params['Wa'] + params['ba']                     # (B, T, H)
    att = jax.nn.softmax(att, axis=1)
    pooled = jnp.einsum('bth,btc->bhc', att, v)               # (B, H, C)
    flat = pooled.reshape(B, -1)
    return flat @ params['Wf'] + params['bf']


def init_params(key, *, inputs_dim, compression_dim, head_nb, outputs_dim,
                number_layers):
    ks = jax.random.split(key, 8)

    def linear(kw, kb, fan_in, fan_out):
        bound = 1.0 / math.sqrt(fan_in)
        W = jax.random.uniform(kw, (fan_in, fan_out), jnp.float32, -bound, bound)
        b = jax.random.uniform(kb, (fan_out,), jnp.float32, -bound, bound)
        return W, b

    Wk, bk = linear(ks[0], ks[1], inputs_dim, compression_dim)
    Wv, bv = linear(ks[2], ks[3], inputs_dim, compression_dim)
    Wa, ba = linear(ks[4], ks[5], compression_dim, head_nb)
    Wf, bf = linear(ks[6], ks[7], head_nb * compression_dim, outputs_dim)
    return {
        'weights_k': jnp.ones((number_layers,), jnp.float32),  # as in __init__
        'weights_v': jnp.ones((number_layers,), jnp.float32),
        'Wk': Wk, 'bk': bk,
        'Wv': Wv, 'bv': bv,
        'Wa': Wa, 'ba': ba,
        'Wf': Wf, 'bf': bf,
    }


if __name__ == "__main__":
    # Small shapes consistent with the module's forward; chosen so both grid
    # axes (batch tiles and time tiles) take more than one step.
    B, D_in, T, L = 16, 32, 16, 5        # batch, inputs_dim, time, number_layers
    H, C, O = 4, 16, 8                   # head_nb, compression_dim, outputs_dim

    key = jax.random.PRNGKey(0)
    k_x, k_p = jax.random.split(key)
    x = jax.random.normal(k_x, (B, D_in, T, L), dtype=jnp.float32)
    params = init_params(k_p, inputs_dim=D_in, compression_dim=C,
                         head_nb=H, outputs_dim=O, number_layers=L)

    out = mhfa_top_pallas(x, params, b_tile=8, t_tile=8)
    out = jax.block_until_ready(out)

    ref = mhfa_top_ref(x, params)
    np.testing.assert_allclose(np.asarray(out), np.asarray(ref),
                               rtol=5e-5, atol=5e-5)
    print("KERNEL_OK")
</pallas_src>

<mosaic_0001>
module attributes {stable_mosaic.version = 11 : i64} {
  func.func @_mhfa_kernel(%arg0: i32, %arg1: i32, %arg2: memref<8x8x160xf32, #tpu.memory_space<vmem>>, %arg3: memref<160x16xf32, #tpu.memory_space<vmem>>, %arg4: memref<1x16xf32, #tpu.memory_space<vmem>>, %arg5: memref<160x4xf32, #tpu.memory_space<vmem>>, %arg6: memref<1x4xf32, #tpu.memory_space<vmem>>, %arg7: memref<4x16x8xf32, #tpu.memory_space<vmem>>, %arg8: memref<1x8xf32, #tpu.memory_space<vmem>>, %arg9: memref<8x8xf32, #tpu.memory_space<vmem>>, %arg10: memref<8x4xf32, #tpu.memory_space<vmem>>, %arg11: memref<8x4xf32, #tpu.memory_space<vmem>>, %arg12: memref<8x4x16xf32, #tpu.memory_space<vmem>>) attributes {dimension_semantics = [#tpu.dimension_semantics<parallel>, #tpu.dimension_semantics<arbitrary>], iteration_bounds = array<i64: 2, 2>, scalar_prefetch = 0 : i64, scratch_operands = 3 : i64, tpu.core_type = #tpu.core_type<tc>, window_params = [{transform_indices = @transform_0, window_bounds = array<i64: 8, 8, 160>}, {pipeline_mode = #tpu.pipeline_mode<synchronous>, transform_indices = @transform_1, window_bounds = array<i64: 160, 16>}, {pipeline_mode = #tpu.pipeline_mode<synchronous>, transform_indices = @transform_2, window_bounds = array<i64: 1, 16>}, {pipeline_mode = #tpu.pipeline_mode<synchronous>, transform_indices = @transform_3, window_bounds = array<i64: 160, 4>}, {pipeline_mode = #tpu.pipeline_mode<synchronous>, transform_indices = @transform_4, window_bounds = array<i64: 1, 4>}, {pipeline_mode = #tpu.pipeline_mode<synchronous>, transform_indices = @transform_5, window_bounds = array<i64: 4, 16, 8>}, {pipeline_mode = #tpu.pipeline_mode<synchronous>, transform_indices = @transform_6, window_bounds = array<i64: 1, 8>}, {transform_indices = @transform_7, window_bounds = array<i64: 8, 8>}]} {
    %c0_i32 = arith.constant 0 : i32
    %0 = arith.cmpi eq, %arg1, %c0_i32 : i32
    %1 = arith.extui %0 : i1 to i32
    %c0_i32_0 = arith.constant 0 : i32
    %2 = arith.cmpi ne, %1, %c0_i32_0 : i32
    scf.if %2 {
      %cst_30 = arith.constant 0xFF800000 : f32
      %42 = vector.broadcast %cst_30 : f32 to vector<8x4xf32>
      %c0_31 = arith.constant 0 : index
      %c0_32 = arith.constant 0 : index
      %43 = vector.load %arg10[%c0_31, %c0_32] : memref<8x4xf32, #tpu.memory_space<vmem>>, vector<8x4xf32>
      tpu.vector_store %arg10[%c0_31, %c0_32], %42 {strides = array<i32>} : memref<8x4xf32, #tpu.memory_space<vmem>>, vector<8x4xf32>,
      %cst_33 = arith.constant 0.000000e+00 : f32
      %44 = vector.broadcast %cst_33 : f32 to vector<8x4xf32>
      %c0_34 = arith.constant 0 : index
      %c0_35 = arith.constant 0 : index
      %45 = vector.load %arg11[%c0_34, %c0_35] : memref<8x4xf32, #tpu.memory_space<vmem>>, vector<8x4xf32>
      tpu.vector_store %arg11[%c0_34, %c0_35], %44 {strides = array<i32>} : memref<8x4xf32, #tpu.memory_space<vmem>>, vector<8x4xf32>,
      %cst_36 = arith.constant 0.000000e+00 : f32
      %46 = vector.broadcast %cst_36 : f32 to vector<8x4x16xf32>
      %c0_37 = arith.constant 0 : index
      %c0_38 = arith.constant 0 : index
      %c0_39 = arith.constant 0 : index
      %47 = vector.load %arg12[%c0_37, %c0_38, %c0_39] : memref<8x4x16xf32, #tpu.memory_space<vmem>>, vector<8x4x16xf32>
      tpu.vector_store %arg12[%c0_37, %c0_38, %c0_39], %46 {strides = array<i32>} : memref<8x4x16xf32, #tpu.memory_space<vmem>>, vector<8x4x16xf32>,
    } else {
    }
    %c0 = arith.constant 0 : index
    %c0_1 = arith.constant 0 : index
    %c0_2 = arith.constant 0 : index
    %3 = vector.load %arg2[%c0, %c0_1, %c0_2] : memref<8x8x160xf32, #tpu.memory_space<vmem>>, vector<8x8x160xf32>
    %4 = vector.shape_cast %3 : vector<8x8x160xf32> to vector<64x160xf32>
    %c0_3 = arith.constant 0 : index
    %c0_4 = arith.constant 0 : index
    %5 = vector.load %arg5[%c0_3, %c0_4] : memref<160x4xf32, #tpu.memory_space<vmem>>, vector<160x4xf32>
    %cst = arith.constant dense<0.000000e+00> : vector<64x4xf32>
    %6 = tpu.matmul %4, %5, %cst {dimension_numbers = #tpu.dot_dimension_numbers<[1], [0], [0], [1], [0, 0, 1, 1], [], []>} : vector<64x160xf32>, vector<160x4xf32>, vector<64x4xf32> -> vector<64x4xf32>
    %c0_5 = arith.constant 0 : index
    %c0_6 = arith.constant 0 : index
    %7 = vector.load %arg6[%c0_5, %c0_6] : memref<1x4xf32, #tpu.memory_space<vmem>>, vector<1x4xf32>
    %8 = vector.broadcast %7 : vector<1x4xf32> to vector<64x4xf32>
    %9 = arith.addf %6, %8 : vector<64x4xf32>
    %c0_7 = arith.constant 0 : index
    %c0_8 = arith.constant 0 : index
    %10 = vector.load %arg3[%c0_7, %c0_8] : memref<160x16xf32, #tpu.memory_space<vmem>>, vector<160x16xf32>
    %cst_9 = arith.constant dense<0.000000e+00> : vector<64x16xf32>
    %11 = tpu.matmul %4, %10, %cst_9 {dimension_numbers = #tpu.dot_dimension_numbers<[1], [0], [0], [1], [0, 0, 1, 1], [], []>} : vector<64x160xf32>, vector<160x16xf32>, vector<64x16xf32> -> vector<64x16xf32>
    %c0_10 = arith.constant 0 : index
    %c0_11 = arith.constant 0 : index
    %12 = vector.load %arg4[%c0_10, %c0_11] : memref<1x16xf32, #tpu.memory_space<vmem>>, vector<1x16xf32>
    %13 = vector.broadcast %12 : vector<1x16xf32> to vector<64x16xf32>
    %14 = arith.addf %11, %13 : vector<64x16xf32>
    %15 = vector.shape_cast %9 : vector<64x4xf32> to vector<8x8x4xf32>
    %16 = vector.shape_cast %14 : vector<64x16xf32> to vector<8x8x16xf32>
    %c0_12 = arith.constant 0 : index
    %c0_13 = arith.constant 0 : index
    %17 = vector.load %arg10[%c0_12, %c0_13] : memref<8x4xf32, #tpu.memory_space<vmem>>, vector<8x4xf32>
    %cst_14 = arith.constant dense<0xFF800000> : vector<8x4xf32>
    %18 = vector.multi_reduction <maximumf>, %15, %cst_14 [1] : vector<8x8x4xf32> to vector<8x4xf32>
    %19 = arith.maximumf %17, %18 : vector<8x4xf32>
    %20 = arith.subf %17, %19 : vector<8x4xf32>
    %21 = math.exp %20 : vector<8x4xf32>
    %22 = vector.shape_cast %19 : vector<8x4xf32> to vector<8x1x4xf32>
    %23 = vector.broadcast %22 : vector<8x1x4xf32> to vector<8x8x4xf32>
    %24 = arith.subf %15, %23 : vector<8x8x4xf32>
    %25 = math.exp %24 : vector<8x8x4xf32>
    %c0_15 = arith.constant 0 : index
    %c0_16 = arith.constant 0 : index
    %26 = vector.load %arg11[%c0_15, %c0_16] : memref<8x4xf32, #tpu.memory_space<vmem>>, vector<8x4xf32>
    %27 = arith.mulf %21, %26 : vector<8x4xf32>
    %cst_17 = arith.constant dense<0.000000e+00> : vector<8x4xf32>
    %28 = vector.multi_reduction <add>, %25, %cst_17 [1] : vector<8x8x4xf32> to vector<8x4xf32>
    %29 = arith.addf %27, %28 : vector<8x4xf32>
    %c0_18 = arith.constant 0 : index
    %c0_19 = arith.constant 0 : index
    %30 = vector.load %arg11[%c0_18, %c0_19] : memref<8x4xf32, #tpu.memory_space<vmem>>, vector<8x4xf32>
    tpu.vector_store %arg11[%c0_18, %c0_19], %29 {strides = array<i32>} : memref<8x4xf32, #tpu.memory_space<vmem>>, vector<8x4xf32>,
    %31 = vector.shape_cast %21 : vector<8x4xf32> to vector<8x4x1xf32>
    %c0_20 = arith.constant 0 : index
    %c0_21 = arith.constant 0 : index
    %c0_22 = arith.constant 0 : index
    %32 = vector.load %arg12[%c0_20, %c0_21, %c0_22] : memref<8x4x16xf32, #tpu.memory_space<vmem>>, vector<8x4x16xf32>
    %33 = vector.broadcast %31 : vector<8x4x1xf32> to vector<8x4x16xf32>
    %34 = arith.mulf %33, %32 : vector<8x4x16xf32>
    "tpu.trace_start"() <{level = 10 : i32, message = "bth,btc->bhc"}> : () -> ()
    %cst_23 = arith.constant dense<0.000000e+00> : vector<8x4x16xf32>
    %35 = tpu.matmul %25, %16, %cst_23 {dimension_numbers = #tpu.dot_dimension_numbers<[1], [1], [2], [2], [0, 0, 0, 2, 1, 2], [0], [0]>} : vector<8x8x4xf32>, vector<8x8x16xf32>, vector<8x4x16xf32> -> vector<8x4x16xf32>
    "tpu.trace_stop"() : () -> ()
    %36 = arith.addf %34, %35 : vector<8x4x16xf32>
    %c0_24 = arith.constant 0 : index
    %c0_25 = arith.constant 0 : index
    %c0_26 = arith.constant 0 : index
    %37 = vector.load %arg12[%c0_24, %c0_25, %c0_26] : memref<8x4x16xf32, #tpu.memory_space<vmem>>, vector<8x4x16xf32>
    tpu.vector_store %arg12[%c0_24, %c0_25, %c0_26], %36 {strides = array<i32>} : memref<8x4x16xf32, #tpu.memory_space<vmem>>, vector<8x4x16xf32>,
    %c0_27 = arith.constant 0 : index
    %c0_28 = arith.constant 0 : index
    %38 = vector.load %arg10[%c0_27, %c0_28] : memref<8x4xf32, #tpu.memory_space<vmem>>, vector<8x4xf32>
    tpu.vector_store %arg10[%c0_27, %c0_28], %19 {strides = array<i32>} : memref<8x4xf32, #tpu.memory_space<vmem>>, vector<8x4xf32>,
    %c1_i32 = arith.constant 1 : i32
    %39 = arith.cmpi eq, %arg1, %c1_i32 : i32
    %40 = arith.extui %39 : i1 to i32
    %c0_i32_29 = arith.constant 0 : i32
    %41 = arith.cmpi ne, %40, %c0_i32_29 : i32
    scf.if %41 {
      %c0_30 = arith.constant 0 : index
      %c0_31 = arith.constant 0 : index
      %c0_32 = arith.constant 0 : index
      %42 = vector.load %arg12[%c0_30, %c0_31, %c0_32] : memref<8x4x16xf32, #tpu.memory_space<vmem>>, vector<8x4x16xf32>
      %c0_33 = arith.constant 0 : index
      %c0_34 = arith.constant 0 : index
      %43 = vector.load %arg11[%c0_33, %c0_34] : memref<8x4xf32, #tpu.memory_space<vmem>>, vector<8x4xf32>
      %44 = vector.shape_cast %43 : vector<8x4xf32> to vector<8x4x1xf32>
      %45 = vector.broadcast %44 : vector<8x4x1xf32> to vector<8x4x16xf32>
      %46 = arith.divf %42, %45 : vector<8x4x16xf32>
      %cst_35 = arith.constant 0.000000e+00 : f32
      %47 = vector.broadcast %cst_35 : f32 to vector<8x8xf32>
      %48 = vector.extract_strided_slice %46 {offsets = [0, 0, 0], sizes = [8, 1, 16], strides = [1, 1, 1]} : vector<8x4x16xf32> to vector<8x1x16xf32>
      %49 = vector.shape_cast %48 : vector<8x1x16xf32> to vector<8x16xf32>
      %c0_36 = arith.constant 0 : index
      %c0_37 = arith.constant 0 : index
      %c0_38 = arith.constant 0 : index
      %50 = vector.load %arg7[%c0_36, %c0_37, %c0_38] : memref<4x16x8xf32, #tpu.memory_space<vmem>>, vector<1x16x8xf32>
      %51 = vector.shape_cast %50 : vector<1x16x8xf32> to vector<16x8xf32>
      %cst_39 = arith.constant dense<0.000000e+00> : vector<8x8xf32>
      %52 = tpu.matmul %49, %51, %cst_39 {dimension_numbers = #tpu.dot_dimension_numbers<[1], [0], [0], [1], [0, 0, 1, 1], [], []>} : vector<8x16xf32>, vector<16x8xf32>, vector<8x8xf32> -> vector<8x8xf32>
      %53 = arith.addf %47, %52 : vector<8x8xf32>
      %54 = vector.extract_strided_slice %46 {offsets = [0, 1, 0], sizes = [8, 1, 16], strides = [1, 1, 1]} : vector<8x4x16xf32> to vector<8x1x16xf32>
      %55 = vector.shape_cast %54 : vector<8x1x16xf32> to vector<8x16xf32>
      %c1 = arith.constant 1 : index
      %c0_40 = arith.constant 0 : index
      %c0_41 = arith.constant 0 : index
      %56 = vector.load %arg7[%c1, %c0_40, %c0_41] : memref<4x16x8xf32, #tpu.memory_space<vmem>>, vector<1x16x8xf32>
      %57 = vector.shape_cast %56 : vector<1x16x8xf32> to vector<16x8xf32>
      %cst_42 = arith.constant dense<0.000000e+00> : vector<8x8xf32>
      %58 = tpu.matmul %55, %57, %cst_42 {dimension_numbers = #tpu.dot_dimension_numbers<[1], [0], [0], [1], [0, 0, 1, 1], [], []>} : vector<8x16xf32>, vector<16x8xf32>, vector<8x8xf32> -> vector<8x8xf32>
      %59 = arith.addf %53, %58 : vector<8x8xf32>
      %60 = vector.extract_strided_slice %46 {offsets = [0, 2, 0], sizes = [8, 1, 16], strides = [1, 1, 1]} : vector<8x4x16xf32> to vector<8x1x16xf32>
      %61 = vector.shape_cast %60 : vector<8x1x16xf32> to vector<8x16xf32>
      %c2 = arith.constant 2 : index
      %c0_43 = arith.constant 0 : index
      %c0_44 = arith.constant 0 : index
      %62 = vector.load %arg7[%c2, %c0_43, %c0_44] : memref<4x16x8xf32, #tpu.memory_space<vmem>>, vector<1x16x8xf32>
      %63 = vector.shape_cast %62 : vector<1x16x8xf32> to vector<16x8xf32>
      %cst_45 = arith.constant dense<0.000000e+00> : vector<8x8xf32>
      %64 = tpu.matmul %61, %63, %cst_45 {dimension_numbers = #tpu.dot_dimension_numbers<[1], [0], [0], [1], [0, 0, 1, 1], [], []>} : vector<8x16xf32>, vector<16x8xf32>, vector<8x8xf32> -> vector<8x8xf32>
      %65 = arith.addf %59, %64 : vector<8x8xf32>
      %66 = vector.extract_strided_slice %46 {offsets = [0, 3, 0], sizes = [8, 1, 16], strides = [1, 1, 1]} : vector<8x4x16xf32> to vector<8x1x16xf32>
      %67 = vector.shape_cast %66 : vector<8x1x16xf32> to vector<8x16xf32>
      %c3 = arith.constant 3 : index
      %c0_46 = arith.constant 0 : index
      %c0_47 = arith.constant 0 : index
      %68 = vector.load %arg7[%c3, %c0_46, %c0_47] : memref<4x16x8xf32, #tpu.memory_space<vmem>>, vector<1x16x8xf32>
      %69 = vector.shape_cast %68 : vector<1x16x8xf32> to vector<16x8xf32>
      %cst_48 = arith.constant dense<0.000000e+00> : vector<8x8xf32>
      %70 = tpu.matmul %67, %69, %cst_48 {dimension_numbers = #tpu.dot_dimension_numbers<[1], [0], [0], [1], [0, 0, 1, 1], [], []>} : vector<8x16xf32>, vector<16x8xf32>, vector<8x8xf32> -> vector<8x8xf32>
      %71 = arith.addf %65, %70 : vector<8x8xf32>
      %c0_49 = arith.constant 0 : index
      %c0_50 = arith.constant 0 : index
      %72 = vector.load %arg8[%c0_49, %c0_50] : memref<1x8xf32, #tpu.memory_space<vmem>>, vector<1x8xf32>
      %73 = vector.broadcast %72 : vector<1x8xf32> to vector<8x8xf32>
      %74 = arith.addf %71, %73 : vector<8x8xf32>
      %c0_51 = arith.constant 0 : index
      %c0_52 = arith.constant 0 : index
      %75 = vector.load %arg9[%c0_51, %c0_52] : memref<8x8xf32, #tpu.memory_space<vmem>>, vector<8x8xf32>
      tpu.vector_store %arg9[%c0_51, %c0_52], %74 {strides = array<i32>} : memref<8x8xf32, #tpu.memory_space<vmem>>, vector<8x8xf32>,
    } else {
    }
    return
  }
  func.func @transform_0(%arg0: i32, %arg1: i32) -> (i32, i32, i32) {
    %c0_i32 = arith.constant 0 : i32
    %c0_i32_0 = arith.constant 0 : i32
    return %arg0, %arg1, %c0_i32 : i32, i32, i32
  }
  func.func @transform_1(%arg0: i32, %arg1: i32) -> (i32, i32) {
    %c0_i32 = arith.constant 0 : i32
    %c0_i32_0 = arith.constant 0 : i32
    %c0_i32_1 = arith.constant 0 : i32
    return %c0_i32, %c0_i32_0 : i32, i32
  }
  func.func @transform_2(%arg0: i32, %arg1: i32) -> (i32, i32) {
    %c0_i32 = arith.constant 0 : i32
    %c0_i32_0 = arith.constant 0 : i32
    %c0_i32_1 = arith.constant 0 : i32
    return %c0_i32, %c0_i32_0 : i32, i32
  }
  func.func @transform_3(%arg0: i32, %arg1: i32) -> (i32, i32) {
    %c0_i32 = arith.constant 0 : i32
    %c0_i32_0 = arith.constant 0 : i32
    %c0_i32_1 = arith.constant 0 : i32
    return %c0_i32, %c0_i32_0 : i32, i32
  }
  func.func @transform_4(%arg0: i32, %arg1: i32) -> (i32, i32) {
    %c0_i32 = arith.constant 0 : i32
    %c0_i32_0 = arith.constant 0 : i32
    %c0_i32_1 = arith.constant 0 : i32
    return %c0_i32, %c0_i32_0 : i32, i32
  }
  func.func @transform_5(%arg0: i32, %arg1: i32) -> (i32, i32, i32) {
    %c0_i32 = arith.constant 0 : i32
    %c0_i32_0 = arith.constant 0 : i32
    %c0_i32_1 = arith.constant 0 : i32
    %c0_i32_2 = arith.constant 0 : i32
    return %c0_i32, %c0_i32_0, %c0_i32_1 : i32, i32, i32
  }
  func.func @transform_6(%arg0: i32, %arg1: i32) -> (i32, i32) {
    %c0_i32 = arith.constant 0 : i32
    %c0_i32_0 = arith.constant 0 : i32
    %c0_i32_1 = arith.constant 0 : i32
    return %c0_i32, %c0_i32_0 : i32, i32
  }
  func.func @transform_7(%arg0: i32, %arg1: i32) -> (i32, i32) {
    %c0_i32 = arith.constant 0 : i32
    %c0_i32_0 = arith.constant 0 : i32
    return %arg0, %c0_i32 : i32, i32
  }
}

</mosaic_0001>

<bundles_post_ra>
// kernel: tpu_custom_call.1
= control target key start
LH: loop header
LB: loop body
LE: loop exit
PB: predicated region body
PF: predicated region fallthrough
CT: control target
= control target key end

     0   :  { %s3392_s0 = inlined_call_operand.hbm [shape: f32[16,16,160], index: 0, kind: input, shape index: {}]   ;;  %s3393_s1 = inlined_call_operand.vmem [shape: f32[160,16], index: 1, kind: input, shape index: {}]   ;;  %s3394_s2 = inlined_call_operand.vmem [shape: f32[1,16], index: 2, kind: input, shape index: {}]   ;;  %s3395_s3 = inlined_call_operand.vmem [shape: f32[160,4], index: 3, kind: input, shape index: {}]   ;;  %s3396_s4 = inlined_call_operand.vmem [shape: f32[1,4], index: 4, kind: input, shape index: {}]   ;;  %s3397_s5 = inlined_call_operand.vmem [shape: f32[4,16,8], index: 5, kind: input, shape index: {}]   ;;  %s3398_s6 = inlined_call_operand.vmem [shape: f32[1,8], index: 6, kind: input, shape index: {}]   ;;  %s3399_s7 = inlined_call_operand.vmem [shape: f32[16,8], index: 7, kind: output, shape index: {}]  }
   0x1   :  { %3402 = sst [smem:[#allocation9_spill]] %s3394_s2 }
   0x2   :  { %3403 = sst [smem:[#allocation10_spill]] %s3397_s5 }
   0x3   :  { %3404 = sst [smem:[#allocation11_spill]] %s3398_s6 }
   0x4   :  { %12 = vsyncpa [#allocation6], 0 }
   0x5   :  { %14 = vsyncpa [#allocation6 + $0x1], 0  ;;  %s2793_s24 = smov 0   ;;  %s2795_s25 = smov 0  }
   0x6   :  { %s2797_s26 = smov 0   ;;  %s2799_s27 = smov 0  }
   0x7   :  { %s2801_s28 = smov 0   ;;  %s2803_s29 = smov 0  }
   0x8   :  { %s2805_s30 = smov 0   ;;  %s2807_s8 = smov 0  }
   0x9 LB: > { %s2381_s9 = sadd.s32 4294967295, %s2740_s8   ;;  %s29_s10 = sadd.s32 1, %s2732_s29  ;;  %s2740_s8 = sphi %s2807_s8, %s20_s8   ;;  %s2736_s30 = sphi %s2805_s30, %s3419_s30   ;;  %s2732_s29 = sphi %s2803_s29, %s3418_s29   ;;  %s2728_s28 = sphi %s2801_s28, %s3417_s28   ;;  %s2724_s27 = sphi %s2799_s27, %s3416_s27   ;;  %s2720_s26 = sphi %s2797_s26, %s3415_s26   ;;  %s2716_s25 = sphi %s2795_s25, %s3414_s25   ;;  %s2712_s24 = sphi %s2793_s24, %s3413_s24  }
   0xa   : > { %p30_p0 = scmp.ge.s32.totalorder %s29_s10, 2  ;;  %s32_s11 = sadd.s32 1, %s2736_s30 }
   0xb   : > { %s41_s12 = sadd.s32 1, %s2720_s26  ;;  %p48_p1 = scmp.ne.s32.totalorder %s2720_s26, %s2716_s25 }
   0xc   : > { %s3421_s10 = smov (%p30_p0, %s29_s10), 0  ;;  %s3423_s11 = smov (!%p30_p0, %s32_s11), %s2736_s30 }
   0xd   : > { %3405 = sst [smem:[#allocation8_spill]] %s3421_s10  ;;  %s37_s13 = ssub.s32 %s2732_s29, %s3421_s10 }
   0xe   : > { %p49_p2 = scmp.eq.s32.totalorder %s2740_s8, 0  ;;  %p34_p3 = scmp.ge.s32.totalorder %s3423_s11, 2 }
   0xf   : > { %p54_p4 = scmp.ne.s32.totalorder %s2716_s25, %s2712_s24  ;;  %p55_p6 = scmp.eq.s32.totalorder %s2381_s9, 0 }
  0x10   : > { %p2844_p5 = por %p49_p2, %p48_p1  ;;  %s3425_s11 = smov (%p34_p3, %s3423_s11), 0 }
  0x11   : > { %p2850_p7 = por %p55_p6, %p54_p4  ;;  %s36_s16 = ssub.s32 %s2736_s30, %s3425_s11 }
  0x12   : > { %p2537_p8 = scmp.lt.s32.totalorder %s2740_s8, 4  ;;  %s38_s17 = sor.u32 %s37_s13, %s36_s16 }
  0x13   : > { %s248_s18 = sand.u32 1, %s2720_s26   ;;  %p39_p9 = scmp.eq.s32.totalorder %s38_s17, 0 }
  0x14   : > { %s2385_s19 = sshll.u32 %s248_s18, 7  ;;  %s2387_s20 = sshll.u32 %s2732_s29, 1 }
  0x15   : > { %s2860_s21 = scalar_select %p39_p9, %s2720_s26, %s41_s12  }
  0x16   : > { %s2434_s22 = sshll.u32 %s2736_s30, 5  ;;  %s252_s24 = scalar_lea.vmem [#allocation5], %s2385_s19 }
  0x17   : > { %s259_s23 = sadd.s32 %s2434_s22, %s2387_s20  ;;  %s262_s9 = sshll.u32 %s252_s24, 4  ;;  %s263_s9 = int_to_ptr.vmem [resolvable:$true] %s262_s9 }
  0x18   : > { %s2389_s10 = sshll.u32 %s259_s23, 7  ;;  %p2870_p10 = pnand %p2537_p8, %p2844_p5 }
  0x19   : > { %s261_s2 = scalar_lea.hbm %s3392_s0, %s2389_s10  ;;  %s249_s16 = scalar_lea.sflag [#allocation6], %s248_s18 }
  0x1a   : > { %p2648_p11 = pneg %p2870_p10  ;;  %s2659_s12 = scalar_lea.vmem %s263_s9, 2048 }
  0x1b   : > { %p2660_p12 = scmp.ne.s32.totalorder %s263_s9, %s2659_s12  ;;  %s2742_s17 = smov [#allocation5]  }
  0x1c   : > { %s2664_s19 = sshll.u32 %s2742_s17, 4  ;;  %s2665_s19 = int_to_ptr.vmem [resolvable:$false] %s2664_s19 }
  0x1d   : > { %p2662_p13 = pnand %p2660_p12, %p2648_p11  ;;  %s2666_s20 = scalar_lea.vmem %s2665_s19, 4096 }
  0x1e   : > { %p2667_p1 = scmp.lt.s32.totalorder %s263_s9, %s2665_s19  ;;  %p2668_p2 = scmp.lt.s32.totalorder %s2666_s20, %s2659_s12 }
  0x1f   : > { %p2663_p0 = pneg %p2662_p13 }
  0x20   : > { %p2669_p3 = por %p2668_p2, %p2667_p1 }
  0x22   : > { %p2670_p4 = pnand %p2669_p3, %p2663_p0 }
  0x24   : > { %2673 = shalt.err (!%p2670_p4)
}
  0x25   : > { %s2743_s5 = smov 512   ;;  %s2744_s6 = smov 256  }
  0x26   : > { %s2745_s10 = smov 16   ;;  %p2390_p5 = scmp.ge.s32.totalorder %s2740_s8, 1 }
  0x27   : > { %2536 = dma.hbm_to_vmem [thread:$0]  (!%p2870_p10), %s261_s2, 2048, %s263_s9, %s249_s16, %s2743_s5, %s2744_s6, %s2745_s10  }
  0x28   : > { %p270_p6 = scmp.lt.s32.totalorder %s2740_s8, 5 }
  0x2a   : > { %p271_p8 = pnand %p2390_p5, %p270_p6 }
  0x2b   : > { %s276_s14 = sand.u32 (!%p271_p8), 1, %s2716_s25  }
  0x2c   : > { %274 = sbr.rel (%p271_p8) target bundleno = 1059 (0x423), region = 48  ;;  %s2391_s18 = sshll.u32 (!%p271_p8), %s276_s14, 7 }
  0x2d   : > { %s277_s22 = scalar_lea.sflag (!%p271_p8), [#allocation6], %s276_s14  ;;  %s2881_s23 = scalar_lea.vmem (!%p271_p8), [#allocation5], %s2391_s18 }
  0x31   : > { %2707 = dma.done.wait (%p2850_p7), %s277_s22, 2048  }
  0x32   : > { %2709 = vsyncadd (%p2850_p7), %s277_s22, 4294965248  ;;  %p311_p9 = scmp.lt.s32.totalorder %s2728_s28, 1  ;;  %p2393_p10 = scmp.ne.s32.totalorder %s2724_s27, 0 }
  0x34   : > { %s3427_s28 = smov (!%p311_p9, %s2728_s28), 1  ;;  %318 = sbr.rel (%p2393_p10) target bundleno = 63 (0x3f), region = 56 }
  0x35   : > { %s2392_s2 = sshll.u32 %s3427_s28, 3 }
  0x36   : > { %s2892_s13 = scalar_lea.vmem %s3399_s7, %s2392_s2 }
  0x39   : > { %vm319_vm0 = vcmask 31744   ;;  %vm322_vm1 = vcmask 125952   ;;  %v2746_v0 = vmov -inf   ;;  %v2747_v1 = vmov 0.0  }
  0x3a   : > { %320 = vst.msk [vmem:[#allocation2] sm:$0xff] %vm319_vm0, %v2746_v0  ;;  %321 = vst.msk [vmem:[#allocation3] sm:$0xff] %vm319_vm0, %v2747_v1 }
  0x3b   : > { %323 = vst.msk [vmem:[#allocation4] sm:$0xf] %vm322_vm1, %v2747_v1  ;;  %324 = vst.msk [vmem:[#allocation4 + $0x4] sm:$0xf] %vm322_vm1, %v2747_v1 }
  0x3c   : > { %325 = vst.msk [vmem:[#allocation4 + $0x8] sm:$0xf] %vm322_vm1, %v2747_v1  ;;  %326 = vst.msk [vmem:[#allocation4 + $0xc] sm:$0xf] %vm322_vm1, %v2747_v1 }
  0x3d   : > { %327 = vst.msk [vmem:[#allocation4 + $0x10] sm:$0xf] %vm322_vm1, %v2747_v1  ;;  %328 = vst.msk [vmem:[#allocation4 + $0x14] sm:$0xf] %vm322_vm1, %v2747_v1 }
  0x3e   : > { %329 = vst.msk [vmem:[#allocation4 + $0x18] sm:$0xf] %vm322_vm1, %v2747_v1  ;;  %330 = vst.msk [vmem:[#allocation4 + $0x1c] sm:$0xf] %vm322_vm1, %v2747_v1 }
  0x3f PF: > { %v362_v2 = vld [vmem:[%s3395_s3 + $0x78] sm:$0xff]  ;;  %v2748_v3 = vmov 0.0   ;;  %v361_v4 = vld [vmem:[%s3395_s3 + $0x70] sm:$0xff]  ;;  %v360_v5 = vld [vmem:[%s3395_s3 + $0x68] sm:$0xff]  ;;  %vm374_vm2 = vcmask 261120   ;;  %vm2749_vm3 = vmmov 0  }
  0x40   : > { %399 = vmatprep.subr.mxu0 %v2748_v3  ;;  %531 = vmatprep.subr.mxu1 %v2748_v3  ;;  %v359_v6 = vld [vmem:[%s3395_s3 + $0x60] sm:$0xff]  ;;  %v332_v7 = vld [vmem:[%s2881_s23 + $0x8] sm:$0xff]  ;;  %v357_v9 = vld [vmem:[%s3395_s3 + $0x50] sm:$0xff]  ;;  %s3409_s12 = sld [smem:[#allocation9_spill]]  ;;  %vm637_vm4 = vcmask 31744   ;;  %vm702_vm5 = vcmask 1041409  }
  0x41   : > { %400 = vmatpush1.msra.mxu0 %v362_v2  ;;  %v358_v8 = vld [vmem:[%s3395_s3 + $0x58] sm:$0xff]  ;;  %2395 = vmatprep.mubr.msk.f32.mxu0 %vm374_vm2, %v332_v7  ;;  %v356_v10 = vld [vmem:[%s3395_s3 + $0x48] sm:$0xff]  ;;  %v518_v12 = vld [vmem:[%s3393_s1 + $0x70] sm:$0xff]  ;;  %vm704_vm6 = vcmask 1042434   ;;  %vm706_vm7 = vcmask 1043459   ;;  %vm708_vm8 = vcmask 1044484  }
  0x42   : > { %401 = vmatprep.subr.mxu0 %v2748_v3  ;;  %2404 = vmatprep.mubr.msk.f32.mxu1 %vm374_vm2, %v332_v7  ;;  %v519_v11 = vld [vmem:[%s3393_s1 + $0x78] sm:$0xff]  ;;  %v355_v13 = vld [vmem:[%s3395_s3 + $0x40] sm:$0xff]  ;;  %v517_v14 = vld [vmem:[%s3393_s1 + $0x68] sm:$0xff]  ;;  %vm710_vm9 = vcmask 1045509   ;;  %vm712_vm10 = vcmask 1046534   ;;  %vm714_vm11 = vcmask 1047559  }
  0x43   : > { %402 = vmatpush1.msra.mxu0 %v361_v4  ;;  %532 = vmatpush1.msra.mxu1 %v519_v11  ;;  %v354_v15 = vld [vmem:[%s3395_s3 + $0x38] sm:$0xff]  ;;  %v516_v16 = vld [vmem:[%s3393_s1 + $0x60] sm:$0xff]  ;;  %v353_v17 = vld [vmem:[%s3395_s3 + $0x30] sm:$0xff]  ;;  %vm1015_vm12 = vcmask 64512   ;;  %vm1832_vm13 = vcmask 125952   ;;  %p2420_p7 = scmp.ne.s32.totalorder %s2724_s27, 1 }
  0x44   : > { %403 = vmatprep.subr.mxu0 %v2748_v3  ;;  %533 = vmatprep.subr.mxu1 %v2748_v3  ;;  %v515_v18 = vld [vmem:[%s3393_s1 + $0x58] sm:$0xff]  ;;  %v352_v19 = vld [vmem:[%s3395_s3 + $0x28] sm:$0xff]  ;;  %v514_v20 = vld [vmem:[%s3393_s1 + $0x50] sm:$0xff]  ;;  %s3410_s19 = sld [smem:[#allocation10_spill]] (!%p2420_p7) }
  0x45   : > { %404 = vmatpush1.msra.mxu0 %v360_v5  ;;  %534 = vmatpush1.msra.mxu1 %v518_v12  ;;  %v351_v21 = vld [vmem:[%s3395_s3 + $0x20] sm:$0xff]  ;;  %v513_v22 = vld [vmem:[%s3393_s1 + $0x48] sm:$0xff]  ;;  %v350_v23 = vld [vmem:[%s3395_s3 + $0x18] sm:$0xff]  ;;  %s3411_s17 = sld [smem:[#allocation11_spill]] (!%p2420_p7) }
  0x46   : > { %405 = vmatprep.subr.mxu0 %v2748_v3  ;;  %535 = vmatprep.subr.mxu1 %v2748_v3  ;;  %v512_v24 = vld [vmem:[%s3393_s1 + $0x40] sm:$0xff]  ;;  %v349_v25 = vld [vmem:[%s3395_s3 + $0x10] sm:$0xff]  ;;  %v511_v26 = vld [vmem:[%s3393_s1 + $0x38] sm:$0xff] }
  0x47   : > { %406 = vmatpush1.msra.mxu0 %v359_v6  ;;  %536 = vmatpush1.msra.mxu1 %v517_v14  ;;  %v348_v27 = vld [vmem:[%s3395_s3 + $0x8] sm:$0xff]  ;;  %v510_v28 = vld [vmem:[%s3393_s1 + $0x30] sm:$0xff]  ;;  %v347_v29 = vld [vmem:[%s3395_s3] sm:$0xff] }
  0x48   : > { %407 = vmatprep.subr.mxu0 %v2748_v3  ;;  %537 = vmatprep.subr.mxu1 %v2748_v3  ;;  %v509_v30 = vld [vmem:[%s3393_s1 + $0x28] sm:$0xff]  ;;  %v366_v31 = vld [vmem:[%s3395_s3 + $0x98] sm:$0xff]  ;;  %v508_v32 = vld [vmem:[%s3393_s1 + $0x20] sm:$0xff] }
  0x49   : > { %408 = vmatpush1.msra.mxu0 %v358_v8  ;;  %538 = vmatpush1.msra.mxu1 %v516_v16  ;;  %v365_v33 = vld [vmem:[%s3395_s3 + $0x90] sm:$0xff]  ;;  %v507_v34 = vld [vmem:[%s3393_s1 + $0x18] sm:$0xff]  ;;  %v364_v35 = vld [vmem:[%s3395_s3 + $0x88] sm:$0xff] }
  0x4a   : > { %409 = vmatprep.subr.mxu0 %v2748_v3  ;;  %539 = vmatprep.subr.mxu1 %v2748_v3  ;;  %v506_v36 = vld [vmem:[%s3393_s1 + $0x10] sm:$0xff]  ;;  %v363_v37 = vld [vmem:[%s3395_s3 + $0x80] sm:$0xff]  ;;  %v505_v39 = vld [vmem:[%s3393_s1 + $0x8] sm:$0xff] }
  0x4b   : > { %410 = vmatpush1.msra.mxu0 %v357_v9  ;;  %540 = vmatpush1.msra.mxu1 %v515_v18  ;;  %v331_v38 = vld [vmem:[%s2881_s23] sm:$0xff]  ;;  %v334_v40 = vld [vmem:[%s2881_s23 + $0x18] sm:$0xff]  ;;  %v504_v41 = vld [vmem:[%s3393_s1] sm:$0xff] }
  0x4c   : > { %411 = vmatprep.subr.mxu0 %v2748_v3  ;;  %541 = vmatprep.subr.mxu1 %v2748_v3  ;;  %v333_v42 = vld [vmem:[%s2881_s23 + $0x10] sm:$0xff]  ;;  %v523_v43 = vld [vmem:[%s3393_s1 + $0x98] sm:$0xff]  ;;  %v522_v45 = vld [vmem:[%s3393_s1 + $0x90] sm:$0xff] }
  0x4d   : > { %412 = vmatpush1.msra.mxu0 %v356_v10  ;;  %542 = vmatpush1.msra.mxu1 %v514_v20  ;;  %v336_v44 = vld [vmem:[%s2881_s23 + $0x28] sm:$0xff]  ;;  %v335_v46 = vld [vmem:[%s2881_s23 + $0x20] sm:$0xff]  ;;  %v521_v47 = vld [vmem:[%s3393_s1 + $0x88] sm:$0xff] }
  0x4e   : > { %413 = vmatprep.subr.mxu0 %v2748_v3  ;;  %543 = vmatprep.subr.mxu1 %v2748_v3  ;;  %v338_v48 = vld [vmem:[%s2881_s23 + $0x38] sm:$0xff]  ;;  %v520_v49 = vld [vmem:[%s3393_s1 + $0x80] sm:$0xff]  ;;  %v340_v51 = vld [vmem:[%s2881_s23 + $0x48] sm:$0xff] }
  0x4f   : > { %414 = vmatpush1.msra.mxu0 %v355_v13  ;;  %544 = vmatpush1.msra.mxu1 %v513_v22  ;;  %v337_v50 = vld [vmem:[%s2881_s23 + $0x30] sm:$0xff]  ;;  %v339_v52 = vld [vmem:[%s2881_s23 + $0x40] sm:$0xff]  ;;  %v342_v53 = vld [vmem:[%s2881_s23 + $0x58] sm:$0xff] }
  0x50   : > { %415 = vmatprep.subr.mxu0 %v2748_v3  ;;  %545 = vmatprep.subr.mxu1 %v2748_v3  ;;  %v341_v54 = vld [vmem:[%s2881_s23 + $0x50] sm:$0xff]  ;;  %v344_v55 = vld [vmem:[%s2881_s23 + $0x68] sm:$0xff]  ;;  %v343_v56 = vld [vmem:[%s2881_s23 + $0x60] sm:$0xff] }
  0x51   : > { %416 = vmatpush1.msra.mxu0 %v354_v15  ;;  %546 = vmatpush1.msra.mxu1 %v512_v24  ;;  %v346_v57 = vld [vmem:[%s2881_s23 + $0x78] sm:$0xff]  ;;  %v345_v58 = vld [vmem:[%s2881_s23 + $0x70] sm:$0xff] }
  0x52   : > { %417 = vmatprep.subr.mxu0 %v2748_v3  ;;  %547 = vmatprep.subr.mxu1 %v2748_v3  ;;  %v3096_v62 = vld [vmem:[%s3396_s4] ss:$0 sm:$0xff] }
  0x53   : > { %418 = vmatpush1.msra.mxu0 %v353_v17  ;;  %548 = vmatpush1.msra.mxu1 %v511_v26  ;;  %v3110_v5 = vld [vmem:[%s3409_s12] ss:$0 sm:$0xff] }
  0x54   : > { %419 = vmatprep.subr.mxu0 %v2748_v3  ;;  %549 = vmatprep.subr.mxu1 %v2748_v3 }
  0x55   : > { %420 = vmatpush1.msra.mxu0 %v352_v19  ;;  %550 = vmatpush1.msra.mxu1 %v510_v28 }
  0x56   : > { %421 = vmatprep.subr.mxu0 %v2748_v3  ;;  %551 = vmatprep.subr.mxu1 %v2748_v3 }
  0x57   : > { %422 = vmatpush1.msra.mxu0 %v351_v21  ;;  %552 = vmatpush1.msra.mxu1 %v509_v30 }
  0x58   : > { %423 = vmatprep.subr.mxu0 %v2748_v3  ;;  %553 = vmatprep.subr.mxu1 %v2748_v3 }
  0x59   : > { %424 = vmatpush1.msra.mxu0 %v350_v23  ;;  %554 = vmatpush1.msra.mxu1 %v508_v32 }
  0x5a   : > { %425 = vmatprep.subr.mxu0 %v2748_v3  ;;  %555 = vmatprep.subr.mxu1 %v2748_v3 }
  0x5b   : > { %426 = vmatpush1.msra.mxu0 %v349_v25  ;;  %556 = vmatpush1.msra.mxu1 %v507_v34 }
  0x5c   : > { %427 = vmatprep.subr.mxu0 %v2748_v3  ;;  %557 = vmatprep.subr.mxu1 %v2748_v3 }
  0x5d   : > { %428 = vmatpush1.msra.mxu0 %v348_v27  ;;  %558 = vmatpush1.msra.mxu1 %v506_v36 }
  0x5e   : > { %429 = vmatprep.subr.mxu0 %v2748_v3  ;;  %559 = vmatprep.subr.mxu1 %v2748_v3 }
  0x5f   : > { %430 = vmatpush1.msra.mxu0 %v347_v29  ;;  %560 = vmatpush1.msra.mxu1 %v505_v39 }
  0x60   : > { %455 = vmatprep.subr.mxu0 %v2748_v3  ;;  %561 = vmatprep.subr.mxu1 %v2748_v3 }
  0x61   : > { %456 = vmatpush2.msra.mxu0 %v366_v31  ;;  %562 = vmatpush1.msra.mxu1 %v504_v41 }
  0x62   : > { %457 = vmatprep.subr.mxu0 %v2748_v3  ;;  %587 = vmatprep.subr.mxu1 %v2748_v3 }
  0x63   : > { %458 = vmatpush2.msra.mxu0 %v365_v33  ;;  %588 = vmatpush2.msra.mxu1 %v523_v43 }
  0x64   : > { %459 = vmatprep.subr.mxu0 %v2748_v3  ;;  %589 = vmatprep.subr.mxu1 %v2748_v3 }
  0x65   : > { %460 = vmatpush2.msra.mxu0 %v364_v35  ;;  %590 = vmatpush2.msra.mxu1 %v522_v45 }
  0x66   : > { %461 = vmatprep.subr.mxu0 %v2748_v3  ;;  %591 = vmatprep.subr.mxu1 %v2748_v3 }
  0x67   : > { %462 = vmatpush2.msra.mxu0 %v363_v37  ;;  %592 = vmatpush2.msra.mxu1 %v521_v47 }
  0x68   : > { %464 = vmatmul.mubr.f32.vlgmr.msra.gmra.mxu0 %v331_v38  ;;  %2463 = vmatprep.subr.mxu0 %v2748_v3 }
  0x69   : > { %2396 = vmatprep.mubr.msk.f32.mxu0 %vm374_vm2, %v334_v40  ;;  %593 = vmatprep.subr.mxu1 %v2748_v3 }
  0x6a   : > { %594 = vmatpush2.msra.mxu1 %v520_v49 }
  0x6b   : > { %596 = vmatmul.mubr.f32.vlgmr.msra.gmra.mxu1 %v331_v38  ;;  %2468 = vmatprep.subr.mxu1 %v2748_v3 }
  0x6c   : > { %469 = vmatmul.mubr.f32.gmra.mxu0 %v333_v42  ;;  %2405 = vmatprep.mubr.msk.f32.mxu1 %vm374_vm2, %v334_v40 }
  0x6d   : > { %2397 = vmatprep.mubr.msk.f32.mxu0 %vm374_vm2, %v336_v44 }
  0x6f   : > { %601 = vmatmul.mubr.f32.gmra.mxu1 %v333_v42 }
  0x70   : > { %474 = vmatmul.mubr.f32.gmra.mxu0 %v335_v46  ;;  %2406 = vmatprep.mubr.msk.f32.mxu1 %vm374_vm2, %v336_v44 }
  0x71   : > { %2398 = vmatprep.mubr.msk.f32.mxu0 %vm374_vm2, %v338_v48 }
  0x73   : > { %606 = vmatmul.mubr.f32.gmra.mxu1 %v335_v46 }
  0x74   : > { %479 = vmatmul.mubr.f32.gmra.mxu0 %v337_v50  ;;  %2407 = vmatprep.mubr.msk.f32.mxu1 %vm374_vm2, %v338_v48 }
  0x75   : > { %2399 = vmatprep.mubr.msk.f32.mxu0 %vm374_vm2, %v340_v51 }
  0x77   : > { %611 = vmatmul.mubr.f32.gmra.mxu1 %v337_v50 }
  0x78   : > { %484 = vmatmul.mubr.f32.gmra.mxu0 %v339_v52  ;;  %2408 = vmatprep.mubr.msk.f32.mxu1 %vm374_vm2, %v340_v51 }
  0x79   : > { %2400 = vmatprep.mubr.msk.f32.mxu0 %vm374_vm2, %v342_v53 }
  0x7b   : > { %616 = vmatmul.mubr.f32.gmra.mxu1 %v339_v52 }
  0x7c   : > { %489 = vmatmul.mubr.f32.gmra.mxu0 %v341_v54  ;;  %2409 = vmatprep.mubr.msk.f32.mxu1 %vm374_vm2, %v342_v53 }
  0x7d   : > { %2401 = vmatprep.mubr.msk.f32.mxu0 %vm374_vm2, %v344_v55 }
  0x7f   : > { %621 = vmatmul.mubr.f32.gmra.mxu1 %v341_v54 }
  0x80   : > { %494 = vmatmul.mubr.f32.gmra.mxu0 %v343_v56  ;;  %2410 = vmatprep.mubr.msk.f32.mxu1 %vm374_vm2, %v344_v55 }
  0x81   : > { %2402 = vmatprep.mubr.msk.f32.mxu0 %vm374_vm2, %v346_v57 }
  0x83   : > { %626 = vmatmul.mubr.f32.gmra.mxu1 %v343_v56 }
  0x84   : > { %499 = vmatmul.mubr.f32.gmra.mxu0 %v345_v58  ;;  %2411 = vmatprep.mubr.msk.f32.mxu1 %vm374_vm2, %v346_v57 }
  0x85   : > { %2465 = vmatprep.mubr.msk.f32.mxu0 %vm2749_vm3, %v2748_v3 }
  0x87   : > { %631 = vmatmul.mubr.f32.gmra.mxu1 %v345_v58 }
  0x88   : > { %2470 = vmatprep.mubr.msk.f32.mxu1 %vm2749_vm3, %v2748_v3 }
 0x128   : > { %v465_v59 = vpop.f32.mrf.mxu0 }
 0x129   : > { %v3102_v2 = vadd.f32 %v3096_v62, %v465_v59 }
 0x12a   : > { %v467_v60 = vpop.f32.mrf.mxu0 }
 0x12b   : > { %v597_v8 = vpop.f32.mrf.mxu1  ;;  %v638_v12 = vsel %vm637_vm4, %v3102_v2, -inf }
 0x12c   : > { %v470_v61 = vpop.f32.mrf.mxu0  ;;  %v598_v11 = vadd.f32 %v3110_v5, %v597_v8  ;;  %v639_v20 = vrot.slane %v638_v12, 4 }
 0x12d   : > { %v3099_v0 = vadd.f32 %v3096_v62, %v470_v61  ;;  %v599_v14 = vpop.f32.mrf.mxu1 }
 0x12e   : > { %v472_v63 = vpop.f32.mrf.mxu0  ;;  %2464 = vmatpush3.msra.mxu0 %v598_v11  ;;  %v640_v31 = vmax.f32 %v638_v12, %v639_v20 }
 0x12f   : > { %v645_v7 = vsel %vm637_vm4, %v3099_v0, -inf  ;;  %v602_v19 = vpop.f32.mrf.mxu1  ;;  %2473 = vmatprep.subr.mxu0 %v2748_v3 }
 0x130   : > { %v475_v1 = vpop.f32.mrf.mxu0  ;;  %v646_v15 = vrot.slane %v645_v7, 4  ;;  %v603_v23 = vadd.f32 %v3110_v5, %v602_v19  ;;  %v641_v44 = vrot.slane %v640_v31, 2 }
 0x131   : > { %v3105_v4 = vadd.f32 %v3096_v62, %v475_v1  ;;  %v604_v25 = vpop.f32.mrf.mxu1 }
 0x132   : > { %v477_v6 = vpop.f32.mrf.mxu0  ;;  %v647_v26 = vmax.f32 %v645_v7, %v646_v15  ;;  %2469 = vmatpush3.msra.mxu1 %v603_v23  ;;  %v642_v58 = vmax.f32 %v640_v31, %v641_v44  ;;  %v726_v31 = vlaneseq }
 0x133   : > { %v652_v9 = vsel %vm637_vm4, %v3105_v4, -inf  ;;  %v607_v30 = vpop.f32.mrf.mxu1  ;;  %2478 = vmatprep.subr.mxu1 %v2748_v3 }
 0x134   : > { %v480_v10 = vpop.f32.mrf.mxu0  ;;  %v653_v17 = vrot.slane %v652_v9, 4  ;;  %v3136_v36 = vadd.f32 %v3110_v5, %v607_v30  ;;  %v648_v38 = vrot.slane %v647_v26, 2 }
 0x135   : > { %v3120_v13 = vadd.f32 %v3096_v62, %v480_v10  ;;  %v609_v37 = vpop.f32.mrf.mxu1 }
 0x136   : > { %v482_v16 = vpop.f32.mrf.mxu0  ;;  %v654_v28 = vmax.f32 %v652_v9, %v653_v17  ;;  %v649_v52 = vmax.f32 %v647_v26, %v648_v38  ;;  %v643_v17 = vrot.slane %v642_v58, 1 }
 0x137   : > { %v659_v18 = vsel %vm637_vm4, %v3120_v13, -inf  ;;  %v612_v43 = vpop.f32.mrf.mxu1 }
 0x138   : > { %v660_v21 = vrot.slane %v659_v18, 4  ;;  %v485_v22 = vpop.f32.mrf.mxu0  ;;  %v655_v41 = vrot.slane %v654_v28, 2  ;;  %v3144_v50 = vadd.f32 %v3110_v5, %v612_v43  ;;  %v650_v9 = vrot.slane %v649_v52, 1 }
 0x139   : > { %v3127_v24 = vadd.f32 %v3096_v62, %v485_v22  ;;  %v614_v51 = vpop.f32.mrf.mxu1 }
 0x13a   : > { %v487_v27 = vpop.f32.mrf.mxu0  ;;  %v661_v32 = vmax.f32 %v659_v18, %v660_v21  ;;  %v656_v55 = vmax.f32 %v654_v28, %v655_v41  ;;  %v651_v23 = vmax.f32 %v649_v52, %v650_v9  ;;  %v3166_v52 = vld [vmem:[#allocation2] sm:$0xff] }
 0x13b   : > { %v666_v29 = vsel %vm637_vm4, %v3127_v24, -inf  ;;  %v617_v57 = vpop.f32.mrf.mxu1 }
 0x13c   : > { %v667_v33 = vrot.slane %v666_v29, 4  ;;  %v490_v34 = vpop.f32.mrf.mxu0  ;;  %v662_v45 = vrot.slane %v661_v32, 2  ;;  %v3152_v7 = vadd.f32 %v3110_v5, %v617_v57  ;;  %v657_v14 = vrot.slane %v656_v55, 1 }
 0x13d   : > { %v3133_v35 = vadd.f32 %v3096_v62, %v490_v34  ;;  %v619_v8 = vpop.f32.mrf.mxu1 }
 0x13e   : > { %v668_v39 = vmax.f32 %v666_v29, %v667_v33  ;;  %v492_v40 = vpop.f32.mrf.mxu0  ;;  %v663_v59 = vmax.f32 %v661_v32, %v662_v45  ;;  %v658_v28 = vmax.f32 %v656_v55, %v657_v14  ;;  %v2750_v29 = vmov 1966171168  }
 0x13f   : > { %v673_v42 = vsel %vm637_vm4, %v3133_v35, -inf  ;;  %v622_v16 = vpop.f32.mrf.mxu1  ;;  %v724_v30 = vunpack.c.l.s4 %v2750_v29  ;;  %v644_v32 = vmax.f32 %v642_v58, %v643_v17  ;;  %v3161_v45 = vshrl.u32 %v726_v31, 7 }
 0x140   : > { %v674_v46 = vrot.slane %v673_v42, 4  ;;  %v495_v47 = vpop.f32.mrf.mxu0  ;;  %v669_v48 = vrot.slane %v668_v39, 2  ;;  %v664_v18 = vrot.slane %v663_v59, 1  ;;  %v3157_v21 = vadd.f32 %v3110_v5, %v622_v16 }
 0x141   : > { %v3141_v49 = vadd.f32 %v3096_v62, %v495_v47  ;;  %v624_v22 = vpop.f32.mrf.mxu1  ;;  %v725_v44 = vunpack.c.0.s8 %v724_v30 }
 0x142   : > { %v675_v53 = vmax.f32 %v673_v42, %v674_v46  ;;  %v497_v54 = vpop.f32.mrf.mxu0  ;;  %v670_v1 = vmax.f32 %v668_v39, %v669_v48  ;;  %v665_v33 = vmax.f32 %v663_v59, %v664_v18  ;;  %v703_v39 = vsel %vm702_vm5, %v651_v23, %v644_v32 }
 0x143   : > { %v680_v56 = vsel %vm637_vm4, %v3141_v49, -inf  ;;  %v705_v42 = vsel %vm704_vm6, %v658_v28, %v703_v39  ;;  %v728_v55 = vsub.s32 %v725_v44, %v3161_v45  ;;  %v3173_v59 = vsub.s32 0, %v3161_v45 }
 0x144   : > { %v676_v60 = vrot.slane %v675_v53, 2  ;;  %v681_v61 = vrot.slane %v680_v56, 4  ;;  %v500_v63 = vpop.f32.mrf.mxu0  ;;  %v707_v46 = vsel %vm706_vm7, %v665_v33, %v705_v42 }
 0x145   : > { %v3149_v6 = vadd.f32 %v3096_v62, %v500_v63  ;;  %v671_v62 = vrot.slane %v670_v1, 1 }
 0x146   : > { %v677_v10 = vmax.f32 %v675_v53, %v676_v60  ;;  %v682_v11 = vmax.f32 %v680_v56, %v681_v61  ;;  %v502_v12 = vpop.f32.mrf.mxu0 }
 0x147   : > { %v687_v15 = vsel %vm637_vm4, %v3149_v6, -inf  ;;  %v672_v38 = vmax.f32 %v670_v1, %v671_v62 }
 0x148   : > { %v683_v19 = vrot.slane %v682_v11, 2  ;;  %v688_v20 = vrot.slane %v687_v15, 4  ;;  %v678_v25 = vrot.slane %v677_v10, 1 }
 0x149   : > { %v709_v48 = vsel %vm708_vm8, %v672_v38, %v707_v46 }
 0x14a   : > { %v684_v26 = vmax.f32 %v682_v11, %v683_v19  ;;  %v689_v27 = vmax.f32 %v687_v15, %v688_v20  ;;  %v679_v40 = vmax.f32 %v677_v10, %v678_v25 }
 0x14c   : > { %v685_v34 = vrot.slane %v684_v26, 1  ;;  %v690_v37 = vrot.slane %v689_v27, 2  ;;  %v711_v51 = vsel %vm710_vm9, %v679_v40, %v709_v48  ;;  %v627_v40 = vpop.f32.mrf.mxu1 }
 0x14e   : > { %v691_v41 = vmax.f32 %v689_v27, %v690_v37  ;;  %v686_v43 = vmax.f32 %v684_v26, %v685_v34 }
 0x150   : > { %v692_v47 = vrot.slane %v691_v41, 1  ;;  %v713_v54 = vsel %vm712_vm10, %v686_v43, %v711_v51 }
 0x152   : > { %v693_v53 = vmax.f32 %v691_v41, %v692_v47 }
 0x154   : > { %v715_v56 = vsel %vm714_vm11, %v693_v53, %v713_v54 }
 0x155   : > { %v717_v57 = vmax.f32 %v3166_v52, %v715_v56 }
 0x157   : > { %v722_v58 = vcombine.high %v717_v57, %v717_v57  ;;  %1841 = vst.msk [vmem:[#allocation2] sm:$0xff] %vm637_vm4, %v717_v57  ;;  %v729_v60 = vrot.slane %v717_v57, %v728_v55 }
 0x159   : > { %v736_v61 = vrot.slane %v722_v58, %v728_v55  ;;  %v745_v63 = vrot.slane %v729_v60, %v728_v55  ;;  %v737_v1 = vcombine.high %v729_v60, %v729_v60 }
 0x15b   : > { %v738_v8 = vcombine.high %v736_v61, %v736_v61  ;;  %v752_v9 = vrot.slane %v736_v61, %v728_v55  ;;  %v774_v10 = vrot.slane %v745_v63, %v3173_v59  ;;  %v767_v11 = vcombine.high %v745_v63, %v745_v63 }
 0x15c   : > { %v759_v12 = vrot.slane %v737_v1, %v728_v55 }
 0x15d   : > { %v766_v14 = vrot.slane %v738_v8, %v728_v55  ;;  %v768_v15 = vcombine.high %v752_v9, %v752_v9  ;;  %v811_v16 = vsub.f32 %v3102_v2, %v774_v10  ;;  %v790_v17 = vrot.slane %v752_v9, %v3173_v59 }
 0x15e   : > { %v782_v18 = vrot.slane %v767_v11, %v3173_v59  ;;  %v778_v19 = vrot.slane %v759_v12, %v3173_v59  ;;  %v769_v20 = vcombine.high %v759_v12, %v759_v12 }
 0x15f   : > { %v770_v62 = vcombine.high %v766_v14, %v766_v14  ;;  %v794_v22 = vrot.slane %v766_v14, %v3173_v59  ;;  %v819_v23 = vmul.f32 1.442695, %v811_v16  ;;  %v815_v25 = vsub.f32 %v3127_v24, %v790_v17 }
 0x160   : > { %v813_v26 = vsub.f32 %v3105_v4, %v782_v18  ;;  %v812_v27 = vsub.f32 %v3099_v0, %v778_v19  ;;  %v786_v28 = vrot.slane %v769_v20, %v3173_v59  ;;  %v798_v2 = vrot.slane %v768_v15, %v3173_v59 }
 0x161   : > { %v802_v29 = vrot.slane %v770_v62, %v3173_v59  ;;  %v816_v30 = vsub.f32 %v3133_v35, %v794_v22  ;;  %2612 = vpow2.f32 %v819_v23  ;;  %v827_v31 = vmul.f32 1.442695, %v815_v25 }
 0x162   : > { %v823_v32 = vmul.f32 1.442695, %v813_v26  ;;  %v821_v33 = vmul.f32 1.442695, %v812_v27  ;;  %v814_v34 = vsub.f32 %v3120_v13, %v786_v28  ;;  %v817_v24 = vsub.f32 %v3141_v49, %v798_v2 }
 0x163   : > { %v818_v4 = vsub.f32 %v3149_v6, %v802_v29  ;;  %2614 = vpow2.f32 %v827_v31  ;;  %v829_v0 = vmul.f32 1.442695, %v816_v30  ;;  %v718_v35 = vsub.f32 %v3166_v52, %v717_v57  ;;  %v629_v6 = vpop.f32.mrf.mxu1 }
 0x164   : > { %2616 = vpow2.f32 %v823_v32  ;;  %v825_v37 = vmul.f32 1.442695, %v814_v34  ;;  %v831_v39 = vmul.f32 1.442695, %v817_v24  ;;  %v3194_v13 = vadd.f32 %v3110_v5, %v627_v40 }
 0x165   : > { %v833_v38 = vmul.f32 1.442695, %v818_v4  ;;  %2618 = vpow2.f32 %v821_v33  ;;  %v719_v46 = vmul.f32 1.442695, %v718_v35  ;;  %v632_v48 = vpop.f32.mrf.mxu1 }
 0x166   : > { %2620 = vpow2.f32 %v825_v37  ;;  %v3200_v55 = vadd.f32 %v3110_v5, %v632_v48 }
 0x167   : > { %2622 = vpow2.f32 %v833_v38  ;;  %v634_v60 = vpop.f32.mrf.mxu1 }
 0x168   : > { %2624 = vpow2.f32 %v829_v0  ;;  %v835_v60 = vld [vmem:[#allocation3] sm:$0xff] }
 0x169   : > { %2626 = vpow2.f32 %v831_v39 }
 0x16a   : > { %2628 = vpow2.f32 %v719_v46 }
 0x16e   : > { %v2613_v41 = vpop.eup %2612 }
 0x16f   : > { %983 = vxpose.xlu0.b32.start.end [1/1] (short) (narrow) %v2613_v41, 8  ;;  %v837_v49 = vsel %vm637_vm4, %v2613_v41, 0.0 }
 0x170   : > { %v2615_v42 = vpop.eup %2614  ;;  %v838_v43 = vrot.slane %v837_v49, 4 }
 0x171   : > { %v2617_v44 = vpop.eup %2616  ;;  %v865_v47 = vsel %vm637_vm4, %v2615_v42, 0.0 }
 0x172   : > { %v2619_v51 = vpop.eup %2618  ;;  %v839_v53 = vadd.f32 %v838_v43, %v837_v49  ;;  %1194 = vxpose.xlu1.b32.start.end [1/1] (short) (narrow) %v2617_v44, 8  ;;  %v851_v52 = vsel %vm637_vm4, %v2617_v44, 0.0  ;;  %v866_v54 = vrot.slane %v865_v47, 4 }
 0x173   : > { %v2621_v56 = vpop.eup %2620  ;;  %v852_v57 = vrot.slane %v851_v52, 4  ;;  %1089 = vxpose.xlu0.b32.start.end [1/1] (short) (narrow) %v2619_v51, 8  ;;  %v844_v58 = vsel %vm637_vm4, %v2619_v51, 0.0 }
 0x174   : > { %v2623_v61 = vpop.eup %2622  ;;  %v840_v63 = vrot.slane %v839_v53, 2  ;;  %v845_v1 = vrot.slane %v844_v58, 4  ;;  %v858_v8 = vsel %vm637_vm4, %v2621_v56, 0.0  ;;  %v867_v9 = vadd.f32 %v866_v54, %v865_v47 }
 0x175   : > { %v2625_v10 = vpop.eup %2624  ;;  %v886_v11 = vsel %vm637_vm4, %v2623_v61, 0.0  ;;  %v853_v12 = vadd.f32 %v852_v57, %v851_v52  ;;  %v859_v14 = vrot.slane %v858_v8, 4 }
 0x176   : > { %v2627_v5 = vpop.eup %2626  ;;  %v887_v15 = vrot.slane %v886_v11, 4  ;;  %v841_v16 = vadd.f32 %v840_v63, %v839_v53  ;;  %v846_v17 = vadd.f32 %v845_v1, %v844_v58  ;;  %1299 = vxpose.xlu1.b32.start.end [1/1] (short) (narrow) %v2621_v56, 8  ;;  %v868_v18 = vrot.slane %v867_v9, 2 }
 0x177   : > { %v854_v19 = vrot.slane %v853_v12, 2  ;;  %v860_v20 = vadd.f32 %v859_v14, %v858_v8  ;;  %1404 = vxpose.xlu0.b32.start.end [1/1] (short) (narrow) %v2615_v42, 8  ;;  %v872_v62 = vsel %vm637_vm4, %v2625_v10, 0.0  ;;  %v879_v22 = vsel %vm637_vm4, %v2627_v5, 0.0  ;;  %v2629_v54 = vpop.eup %2628 }
 0x178   : > { %v888_v23 = vadd.f32 %v887_v15, %v886_v11  ;;  %v847_v25 = vrot.slane %v846_v17, 2  ;;  %v869_v26 = vadd.f32 %v868_v18, %v867_v9  ;;  %v873_v2 = vrot.slane %v872_v62, 4 }
 0x179   : > { %v855_v27 = vadd.f32 %v854_v19, %v853_v12  ;;  %v861_v28 = vrot.slane %v860_v20, 2  ;;  %v880_v29 = vrot.slane %v879_v22, 4  ;;  %v842_v31 = vrot.slane %v841_v16, 1 }
 0x17a   : > { %v889_v30 = vrot.slane %v888_v23, 2  ;;  %v848_v32 = vadd.f32 %v847_v25, %v846_v17  ;;  %1509 = vxpose.xlu1.b32.start.end [1/1] (short) (narrow) %v2625_v10, 8  ;;  %v874_v24 = vadd.f32 %v873_v2, %v872_v62  ;;  %v870_v38 = vrot.slane %v869_v26, 1 }
 0x17b   : > { %v856_v33 = vrot.slane %v855_v27, 1  ;;  %v862_v34 = vadd.f32 %v861_v28, %v860_v20  ;;  %1614 = vxpose.xlu0.b32.start.end [1/1] (short) (narrow) %v2627_v5, 8  ;;  %v881_v4 = vadd.f32 %v880_v29, %v879_v22  ;;  %v843_v49 = vadd.f32 %v842_v31, %v841_v16 }
 0x17c   : > { %v890_v0 = vadd.f32 %v889_v30, %v888_v23  ;;  %v849_v37 = vrot.slane %v848_v32, 1  ;;  %v875_v40 = vrot.slane %v874_v24, 2  ;;  %v871_v47 = vadd.f32 %v870_v38, %v869_v26 }
 0x17d   : > { %v857_v39 = vadd.f32 %v856_v33, %v855_v27  ;;  %v863_v35 = vrot.slane %v862_v34, 1  ;;  %v882_v41 = vrot.slane %v881_v4, 2  ;;  %v836_v8 = vmul.f32 %v2629_v54, %v835_v60  ;;  %v967_v33 = vld [vmem:[#allocation4] sm:$0xf] }
 0x17e   : > { %v850_v6 = vadd.f32 %v849_v37, %v848_v32  ;;  %1719 = vxpose.xlu1.b32.start.end [1/1] (short) (narrow) %v2623_v61, 8  ;;  %v876_v43 = vadd.f32 %v875_v40, %v874_v24  ;;  %v891_v48 = vrot.slane %v890_v0, 1  ;;  %v920_v12 = vsub.s32 1, %v3161_v45 }
 0x17f   : > { %v864_v42 = vadd.f32 %v863_v35, %v862_v34  ;;  %v883_v44 = vadd.f32 %v882_v41, %v881_v4  ;;  %v927_v5 = vsub.s32 2, %v3161_v45  ;;  %v934_v16 = vsub.s32 3, %v3161_v45  ;;  %v968_v4 = vld [vmem:[#allocation4 + $0x4] sm:$0xf]  ;;  %v971_v41 = vld [vmem:[#allocation4 + $0x10] sm:$0xf] }
 0x180   : > { %v901_v46 = vsel %vm702_vm5, %v850_v6, %v843_v49  ;;  %v877_v53 = vrot.slane %v876_v43, 1  ;;  %v892_v61 = vadd.f32 %v891_v48, %v890_v0  ;;  %v921_v14 = vrot.slane %v2629_v54, %v920_v12  ;;  %v969_v0 = vld [vmem:[#allocation4 + $0x8] sm:$0xf] }
 0x181   : > { %v902_v51 = vsel %vm704_vm6, %v857_v39, %v901_v46  ;;  %v884_v52 = vrot.slane %v883_v44, 1  ;;  %v928_v15 = vrot.slane %v2629_v54, %v927_v5  ;;  %v935_v17 = vrot.slane %v2629_v54, %v934_v16 }
 0x182   : > { %v903_v56 = vsel %vm706_vm7, %v864_v42, %v902_v51  ;;  %v878_v58 = vadd.f32 %v877_v53, %v876_v43  ;;  %v914_v18 = vrot.slane %v2629_v54, %v3173_v59  ;;  %v941_v19 = vsub.s32 4, %v3161_v45 }
 0x183   : > { %v904_v57 = vsel %vm708_vm8, %v871_v47, %v903_v56  ;;  %v885_v63 = vadd.f32 %v884_v52, %v883_v44  ;;  %v948_v20 = vsub.s32 5, %v3161_v45  ;;  %v955_v23 = vsub.s32 6, %v3161_v45  ;;  %v972_v52 = vld [vmem:[#allocation4 + $0x14] sm:$0xf] }
 0x184   : > { %v905_v1 = vsel %vm710_vm9, %v878_v58, %v904_v57  ;;  %v942_v62 = vrot.slane %v2629_v54, %v941_v19  ;;  %v962_v25 = vsub.s32 7, %v3161_v45 }
 0x185   : > { %v906_v9 = vsel %vm712_vm10, %v885_v63, %v905_v1  ;;  %v949_v22 = vrot.slane %v2629_v54, %v948_v20  ;;  %v956_v26 = vrot.slane %v2629_v54, %v955_v23 }
 0x186   : > { %v907_v10 = vsel %vm714_vm11, %v892_v61, %v906_v9  ;;  %v963_v27 = vrot.slane %v2629_v54, %v962_v25  ;;  %v973_v54 = vld [vmem:[#allocation4 + $0x18] sm:$0xf] }
 0x187   : > { %v909_v11 = vadd.f32 %v907_v10, %v836_v8  ;;  %v974_v10 = vld [vmem:[#allocation4 + $0x1c] sm:$0xf] }
 0x189   : > { %910 = vst.msk [vmem:[#allocation3] sm:$0xff] %vm637_vm4, %v909_v11 }
 0x19c   : > { %923 = vbcast.lane.b32.xlu1 %v921_v14, 256 }
 0x1a0   : > { %930 = vbcast.lane.b32.xlu1 %v928_v15, 256 }
 0x1a4   : > { %937 = vbcast.lane.b32.xlu1 %v935_v17, 256  ;;  %916 = vbcast.lane.b32.xlu0 %v914_v18, 256 }
 0x1a8   : > { %944 = vbcast.lane.b32.xlu1 %v942_v62, 256  ;;  %951 = vbcast.lane.b32.xlu0 %v949_v22, 256 }
 0x1ac   : > { %958 = vbcast.lane.b32.xlu1 %v956_v26, 256  ;;  %965 = vbcast.lane.b32.xlu0 %v963_v27, 256 }
 0x1eb   : > { %v999_v28 = vpop.trf.xlu0 }
 0x1ec   : > { %2466 = vmatmul.mubr.msk.f32.vlgmr.msra.gmra.mxu0 %vm1015_vm12, %v999_v28 }
 0x1ed   : > { %2474 = vmatpush3.msra.mxu0 %v3136_v36  ;;  %2475 = vmatprep.mubr.msk.f32.mxu0 %vm2749_vm3, %v2748_v3 }
 0x1ee   : > { %2483 = vmatprep.subr.mxu0 %v2748_v3  ;;  %v1210_v2 = vpop.trf.xlu1 }
 0x1ef   : > { %v1105_v29 = vpop.trf.xlu0 }
 0x1f0   : > { %2471 = vmatmul.mubr.msk.f32.vlgmr.msra.gmra.mxu1 %vm1015_vm12, %v1105_v29  ;;  %2476 = vmatmul.mubr.msk.f32.vlgmr.msra.gmra.mxu0 %vm1015_vm12, %v1210_v2 }
 0x1f1   : > { %2479 = vmatpush3.msra.mxu1 %v3144_v50  ;;  %2484 = vmatpush3.msra.mxu0 %v3152_v7 }
 0x1f2   : > { %2480 = vmatprep.mubr.msk.f32.mxu1 %vm2749_vm3, %v2748_v3  ;;  %2485 = vmatprep.mubr.msk.f32.mxu0 %vm2749_vm3, %v2748_v3  ;;  %v1315_v36 = vpop.trf.xlu1 }
 0x1f3   : > { %2488 = vmatprep.subr.mxu1 %v2748_v3  ;;  %2493 = vmatprep.subr.mxu0 %v2748_v3  ;;  %v1420_v30 = vpop.trf.xlu0 }
 0x1f4   : > { %2481 = vmatmul.mubr.msk.f32.vlgmr.msra.gmra.mxu1 %vm1015_vm12, %v1315_v36  ;;  %2486 = vmatmul.mubr.msk.f32.vlgmr.msra.gmra.mxu0 %vm1015_vm12, %v1420_v30 }
 0x1f5   : > { %2489 = vmatpush3.msra.mxu1 %v3157_v21  ;;  %2494 = vmatpush3.msra.mxu0 %v3194_v13 }
 0x1f6   : > { %2490 = vmatprep.mubr.msk.f32.mxu1 %vm2749_vm3, %v2748_v3  ;;  %2495 = vmatprep.mubr.msk.f32.mxu0 %vm2749_vm3, %v2748_v3  ;;  %v1525_v50 = vpop.trf.xlu1 }
 0x1f7   : > { %2498 = vmatprep.subr.mxu1 %v2748_v3  ;;  %v1630_v7 = vpop.trf.xlu0 }
 0x1f8   : > { %2491 = vmatmul.mubr.msk.f32.vlgmr.msra.gmra.mxu1 %vm1015_vm12, %v1525_v50  ;;  %2496 = vmatmul.mubr.msk.f32.vlgmr.msra.gmra.mxu0 %vm1015_vm12, %v1630_v7 }
 0x1f9   : > { %2499 = vmatpush3.msra.mxu1 %v3200_v55  ;;  %2500 = vmatprep.mubr.msk.f32.mxu1 %vm2749_vm3, %v2748_v3  ;;  %v970_v3 = vld [vmem:[#allocation4 + $0xc] sm:$0xf] }
 0x1fa   : > { %v1735_v21 = vpop.trf.xlu1 }
 0x1fc   : > { %2501 = vmatmul.mubr.msk.f32.vlgmr.msra.gmra.mxu1 %vm1015_vm12, %v1735_v21 }
 0x20e   : > { %v924_v13 = vpop.permute.xlu1 %923 }
 0x20f   : > { %v976_v55 = vmul.f32 %v968_v4, %v924_v13 }
 0x212   : > { %v931_v31 = vpop.permute.xlu1 %930 }
 0x213   : > { %v977_v40 = vmul.f32 %v969_v0, %v931_v31 }
 0x216   : > { %v938_v32 = vpop.permute.xlu1 %937  ;;  %v917_v34 = vpop.permute.xlu0 %916 }
 0x217   : > { %v975_v24 = vmul.f32 %v967_v33, %v917_v34  ;;  %v978_v48 = vmul.f32 %v970_v3, %v938_v32 }
 0x21a   : > { %v945_v38 = vpop.permute.xlu1 %944  ;;  %v952_v42 = vpop.permute.xlu0 %951 }
 0x21b   : > { %v979_v51 = vmul.f32 %v971_v41, %v945_v38  ;;  %v980_v1 = vmul.f32 %v972_v52, %v952_v42 }
 0x21e   : > { %v959_v53 = vpop.permute.xlu1 %958  ;;  %v966_v9 = vpop.permute.xlu0 %965 }
 0x21f   : > { %v981_v8 = vmul.f32 %v973_v54, %v959_v53  ;;  %v982_v22 = vmul.f32 %v974_v10, %v966_v9 }
 0x2ac   : > { %v1085_v37 = vpop.f32.mrf.mxu0 }
 0x2ad   : > { %v1824_v39 = vadd.f32 %v1085_v37, %v975_v24 }
 0x2ae   : > { %v2467_v35 = vpop.f32.mrf.mxu0 }
 0x2af   : > { %1833 = vst.msk [vmem:[#allocation4] sm:$0xf] %vm1832_vm13, %v1824_v39 }
 0x2b0   : > { %v1190_v49 = vpop.f32.mrf.mxu1  ;;  %v1295_v6 = vpop.f32.mrf.mxu0 }
 0x2b1   : > { %v1825_v43 = vadd.f32 %v1190_v49, %v976_v55  ;;  %v1826_v44 = vadd.f32 %v1295_v6, %v977_v40 }
 0x2b2   : > { %v2472_v46 = vpop.f32.mrf.mxu1  ;;  %v2477_v47 = vpop.f32.mrf.mxu0 }
 0x2b3   : > { %1834 = vst.msk [vmem:[#allocation4 + $0x4] sm:$0xf] %vm1832_vm13, %v1825_v43  ;;  %1835 = vst.msk [vmem:[#allocation4 + $0x8] sm:$0xf] %vm1832_vm13, %v1826_v44 }
 0x2b4   : > { %v1400_v56 = vpop.f32.mrf.mxu1  ;;  %v1505_v57 = vpop.f32.mrf.mxu0 }
 0x2b5   : > { %v1827_v58 = vadd.f32 %v1400_v56, %v978_v48  ;;  %v1828_v60 = vadd.f32 %v1505_v57, %v979_v51 }
 0x2b6   : > { %v2482_v63 = vpop.f32.mrf.mxu1  ;;  %v2487_v61 = vpop.f32.mrf.mxu0 }
 0x2b7   : > { %1836 = vst.msk [vmem:[#allocation4 + $0xc] sm:$0xf] %vm1832_vm13, %v1827_v58  ;;  %1837 = vst.msk [vmem:[#allocation4 + $0x10] sm:$0xf] %vm1832_vm13, %v1828_v60 }
 0x2b8   : > { %v1610_v11 = vpop.f32.mrf.mxu1  ;;  %v1715_v14 = vpop.f32.mrf.mxu0 }
 0x2b9   : > { %v1829_v15 = vadd.f32 %v1610_v11, %v980_v1  ;;  %v1830_v17 = vadd.f32 %v1715_v14, %v981_v8 }
 0x2ba   : > { %v2492_v18 = vpop.f32.mrf.mxu1  ;;  %v2497_v62 = vpop.f32.mrf.mxu0 }
 0x2bb   : > { %1838 = vst.msk [vmem:[#allocation4 + $0x14] sm:$0xf] %vm1832_vm13, %v1829_v15  ;;  %1839 = vst.msk [vmem:[#allocation4 + $0x18] sm:$0xf] %vm1832_vm13, %v1830_v17  ;;  %1845 = sbr.rel (%p2420_p7) target bundleno = 1059 (0x423), region = 60 }
 0x2bc   : > { %v1820_v26 = vpop.f32.mrf.mxu1 }
 0x2bd   : > { %v1831_v27 = vadd.f32 %v1820_v26, %v982_v22 }
 0x2be   : > { %v2502_v28 = vpop.f32.mrf.mxu1 }
 0x2bf   : > { %1840 = vst.msk [vmem:[#allocation4 + $0x1c] sm:$0xf] %vm1832_vm13, %v1831_v27 }
 0x2c0   : > { %v1854_v2 = vld [vmem:[#allocation3] sm:$0xff]  ;;  %v2421_v45 = vld [vmem:[%s3410_s19 + $0x10] sm:$0xff]  ;;  %vm2752_vm14 = vmmov 0   ;;  %v1849_v55 = vld [vmem:[#allocation4 + $0xc] sm:$0xf]  ;;  %vm1954_vm15 = vcmask 130048  }
 0x2c1   : > { %v1865_v29 = vrot.slane %v1854_v2, %v920_v12  ;;  %v1858_v36 = vrot.slane %v1854_v2, %v3173_v59  ;;  %v1879_v30 = vrot.slane %v1854_v2, %v934_v16  ;;  %v1872_v50 = vrot.slane %v1854_v2, %v927_v5  ;;  %v2422_v5 = vld [vmem:[%s3410_s19 + $0x18] sm:$0xff]  ;;  %v1928_v16 = vld [vmem:[%s3410_s19 + $0x8] sm:$0xff]  ;;  %v1847_v34 = vld [vmem:[#allocation4 + $0x4] sm:$0xf] }
 0x2c2   : > { %v1886_v7 = vrot.slane %v1854_v2, %v941_v19  ;;  %v1893_v21 = vrot.slane %v1854_v2, %v948_v20  ;;  %v1900_v59 = vrot.slane %v1854_v2, %v955_v23  ;;  %v1907_v12 = vrot.slane %v1854_v2, %v962_v25  ;;  %v1927_v20 = vld [vmem:[%s3410_s19] sm:$0xff]  ;;  %v1846_v0 = vld [vmem:[#allocation4] sm:$0xf]  ;;  %v1848_v40 = vld [vmem:[#allocation4 + $0x8] sm:$0xf] }
 0x2c3   : > { %1867 = vbcast.lane.b32.xlu1 %v1865_v29, 256  ;;  %1860 = vbcast.lane.b32.xlu0 %v1858_v36, 256  ;;  %v2751_v19 = vmov 0.0   ;;  %v1850_v47 = vld [vmem:[#allocation4 + $0x10] sm:$0xf] }
 0x2c4   : > { %2503 = vmatprep.subr.mxu0 %v2751_v19  ;;  %2510 = vmatprep.subr.mxu1 %v2751_v19  ;;  %v1851_v51 = vld [vmem:[#allocation4 + $0x14] sm:$0xf]  ;;  %v1852_v14 = vld [vmem:[#allocation4 + $0x18] sm:$0xf] }
 0x2c5   : > { %2504 = vmatpush3.msra.mxu0 %v2422_v5  ;;  %2511 = vmatpush3.msra.mxu1 %v1928_v16 }
 0x2c6   : > { %2505 = vmatprep.subr.mxu0 %v2751_v19  ;;  %2512 = vmatprep.subr.mxu1 %v2751_v19  ;;  %v1853_v62 = vld [vmem:[#allocation4 + $0x1c] sm:$0xf] }
 0x2c7   : > { %1881 = vbcast.lane.b32.xlu1 %v1879_v30, 256  ;;  %1874 = vbcast.lane.b32.xlu0 %v1872_v50, 256 }
 0x2c8   : > { %2506 = vmatpush3.msra.mxu0 %v2421_v45  ;;  %2507 = vmatprep.mubr.msk.f32.mxu0 %vm2752_vm14, %v2751_v19 }
 0x2c9   : > { %2513 = vmatpush3.msra.mxu1 %v1927_v20  ;;  %2514 = vmatprep.mubr.msk.f32.mxu1 %vm2752_vm14, %v2751_v19 }
 0x2ca   : > { %2517 = vmatprep.subr.mxu0 %v2751_v19  ;;  %2524 = vmatprep.subr.mxu1 %v2751_v19 }
 0x2cb   : > { %1888 = vbcast.lane.b32.xlu0 %v1886_v7, 256  ;;  %1895 = vbcast.lane.b32.xlu1 %v1893_v21, 256 }
 0x2cf   : > { %1902 = vbcast.lane.b32.xlu0 %v1900_v59, 256  ;;  %1909 = vbcast.lane.b32.xlu1 %v1907_v12, 256 }
 0x335   : > { %v1868_v23 = vpop.permute.xlu1 %1867  ;;  %v1861_v25 = vpop.permute.xlu0 %1860 }
 0x336   : > { %2630 = vrcp.f32 %v1868_v23 }
 0x337   : > { %2632 = vrcp.f32 %v1861_v25 }
 0x339   : > { %v1882_v13 = vpop.permute.xlu1 %1881  ;;  %v1875_v31 = vpop.permute.xlu0 %1874 }
 0x33a   : > { %2634 = vrcp.f32 %v1882_v13 }
 0x33b   : > { %2636 = vrcp.f32 %v1875_v31 }
 0x33d   : > { %v1889_v32 = vpop.permute.xlu0 %1888  ;;  %v1896_v33 = vpop.permute.xlu1 %1895 }
 0x33e   : > { %2638 = vrcp.f32 %v1889_v32 }
 0x33f   : > { %2640 = vrcp.f32 %v1896_v33 }
 0x341   : > { %v1903_v24 = vpop.permute.xlu0 %1902  ;;  %v1910_v4 = vpop.permute.xlu1 %1909 }
 0x342   : > { %2642 = vrcp.f32 %v1903_v24 }
 0x343   : > { %v2631_v37 = vpop.eup %2630  ;;  %2644 = vrcp.f32 %v1910_v4 }
 0x344   : > { %v2633_v38 = vpop.eup %2632  ;;  %v1914_v39 = vmul.f32 %v2631_v37, %v1847_v34 }
 0x345   : > { %v1912_v35 = vmul.f32 %v2633_v38, %v1846_v0  ;;  %v2426_v38 = vld [vmem:[%s3410_s19 + $0x28] sm:$0xff] }
 0x346   : > { %v2117_v3 = vrot.slane %v1914_v39, 1  ;;  %v2027_v49 = vrot.slane %v1914_v39, 7  ;;  %v2207_v54 = vrot.slane %v1914_v39, 2 }
 0x347   : > { %v2635_v41 = vpop.eup %2634  ;;  %v2116_v6 = vrot.slane %v1912_v35, 2  ;;  %v1940_v44 = vrot.slane %v1912_v35, 1  ;;  %v2206_v52 = vrot.slane %v1912_v35, 3 }
 0x348   : > { %v2637_v42 = vpop.eup %2636  ;;  %v1918_v43 = vmul.f32 %v2635_v41, %v1849_v55  ;;  %v2028_v58 = vsel %vm702_vm5, %v2027_v49, %v1912_v35  ;;  %v2425_v49 = vld [vmem:[%s3410_s19 + $0x20] sm:$0xff] }
 0x349   : > { %v1916_v46 = vmul.f32 %v2637_v42, %v1848_v40  ;;  %v2118_v48 = vsel %vm702_vm5, %v2117_v3, %v2116_v6  ;;  %v1941_v8 = vsel %vm702_vm5, %v1914_v39, %v1940_v44  ;;  %v2208_v28 = vsel %vm702_vm5, %v2207_v54, %v2206_v52  ;;  %v2429_v39 = vld [vmem:[%s3410_s19 + $0x38] sm:$0xff] }
 0x34a   : > { %v1944_v53 = vrot.slane %v1918_v43, 6  ;;  %v2031_v63 = vrot.slane %v1918_v43, 5  ;;  %v2120_v10 = vrot.slane %v1918_v43, 7 }
 0x34b   : > { %v2639_v56 = vpop.eup %2638  ;;  %v1942_v57 = vrot.slane %v1916_v46, 7  ;;  %v2029_v60 = vrot.slane %v1916_v46, 6  ;;  %v2119_v9 = vsel %vm704_vm6, %v1916_v46, %v2118_v48  ;;  %v2209_v18 = vrot.slane %v1916_v46, 1  ;;  %v2428_v46 = vld [vmem:[%s3410_s19 + $0x30] sm:$0xff] }
 0x34c   : > { %v2641_v61 = vpop.eup %2640  ;;  %v1920_v1 = vmul.f32 %v2639_v56, %v1850_v47  ;;  %v2121_v5 = vsel %vm706_vm7, %v2120_v10, %v2119_v9 }
 0x34d   : > { %v1922_v11 = vmul.f32 %v2641_v61, %v1851_v51  ;;  %v1943_v15 = vsel %vm704_vm6, %v1942_v57, %v1941_v8  ;;  %v2030_v17 = vsel %vm704_vm6, %v2029_v60, %v2028_v58  ;;  %v2210_v23 = vsel %vm704_vm6, %v2209_v18, %v2208_v28 }
 0x34e   : > { %v1945_v22 = vsel %vm706_vm7, %v1944_v53, %v1943_v15  ;;  %v1946_v26 = vrot.slane %v1920_v1, 5  ;;  %v2033_v27 = vrot.slane %v1920_v1, 4  ;;  %v2032_v36 = vsel %vm706_vm7, %v2031_v63, %v2030_v17 }
 0x34f   : > { %v2643_v2 = vpop.eup %2642  ;;  %v1948_v29 = vrot.slane %v1922_v11, 4  ;;  %v2035_v30 = vrot.slane %v1922_v11, 3  ;;  %v2122_v50 = vrot.slane %v1920_v1, 6  ;;  %v2124_v20 = vrot.slane %v1922_v11, 5 }
 0x350   : > { %v2645_v7 = vpop.eup %2644  ;;  %v1924_v21 = vmul.f32 %v2643_v2, %v1852_v14  ;;  %v1947_v59 = vsel %vm708_vm8, %v1946_v26, %v1945_v22  ;;  %v2034_v12 = vsel %vm708_vm8, %v2033_v27, %v2032_v36  ;;  %v2212_v4 = vrot.slane %v1920_v1, 7 }
 0x351   : > { %v1926_v16 = vmul.f32 %v2645_v7, %v1853_v62  ;;  %v1949_v45 = vsel %vm710_vm9, %v1948_v29, %v1947_v59  ;;  %v2036_v13 = vsel %vm710_vm9, %v2035_v30, %v2034_v12  ;;  %v2123_v32 = vsel %vm708_vm8, %v2122_v50, %v2121_v5 }
 0x352   : > { %v1950_v25 = vrot.slane %v1924_v21, 3  ;;  %v2037_v31 = vrot.slane %v1924_v21, 2  ;;  %v2126_v24 = vrot.slane %v1924_v21, 4  ;;  %v2211_v35 = vsel %vm706_vm7, %v1918_v43, %v2210_v23 }
 0x353   : > { %v1952_v33 = vrot.slane %v1926_v16, 2  ;;  %v2039_v34 = vrot.slane %v1926_v16, 1  ;;  %v2214_v55 = vrot.slane %v1922_v11, 6  ;;  %v2213_v41 = vsel %vm708_vm8, %v2212_v4, %v2211_v35 }
 0x354   : > { %v1951_v0 = vsel %vm712_vm10, %v1950_v25, %v1949_v45  ;;  %v2038_v37 = vsel %vm712_vm10, %v2037_v31, %v2036_v13  ;;  %v2125_v6 = vsel %vm710_vm9, %v2124_v20, %v2123_v32  ;;  %v2128_v42 = vrot.slane %v1926_v16, 3 }
 0x355   : > { %v1953_v40 = vsel %vm714_vm11, %v1952_v33, %v1951_v0  ;;  %v2040_v3 = vsel %vm714_vm11, %v2039_v34, %v2038_v37  ;;  %v2216_v44 = vrot.slane %v1924_v21, 5  ;;  %v2218_v43 = vrot.slane %v1926_v16, 4 }
 0x356   : > { %2508 = vmatmul.mubr.msk.f32.vlgmr.msra.gmra.mxu0 %vm1954_vm15, %v1953_v40  ;;  %2515 = vmatmul.mubr.msk.f32.vlgmr.msra.gmra.mxu1 %vm1954_vm15, %v2040_v3  ;;  %v2127_v47 = vsel %vm712_vm10, %v2126_v24, %v2125_v6  ;;  %v2215_v48 = vsel %vm710_vm9, %v2214_v55, %v2213_v41 }
 0x357   : > { %2518 = vmatpush3.msra.mxu0 %v2426_v38  ;;  %2525 = vmatpush3.msra.mxu1 %v2429_v39  ;;  %v2217_v51 = vsel %vm712_vm10, %v2216_v44, %v2215_v48  ;;  %v2129_v53 = vsel %vm714_vm11, %v2128_v42, %v2127_v47 }
 0x358   : > { %2519 = vmatprep.subr.mxu0 %v2751_v19  ;;  %2526 = vmatprep.subr.mxu1 %v2751_v19  ;;  %v2219_v52 = vsel %vm714_vm11, %v2218_v43, %v2217_v51 }
 0x359   : > { %2520 = vmatpush3.msra.mxu0 %v2425_v49  ;;  %2521 = vmatprep.mubr.msk.f32.mxu0 %vm2752_vm14, %v2751_v19 }
 0x35a   : > { %2527 = vmatpush3.msra.mxu1 %v2428_v46  ;;  %2528 = vmatprep.mubr.msk.f32.mxu1 %vm2752_vm14, %v2751_v19  ;;  %v2431_v19 = vld [vmem:[%s3411_s17] ss:$0 sm:$0xff] }
 0x35b   : > { %2522 = vmatmul.mubr.msk.f32.vlgmr.msra.gmra.mxu0 %vm1954_vm15, %v2129_v53  ;;  %2529 = vmatmul.mubr.msk.f32.vlgmr.msra.gmra.mxu1 %vm1954_vm15, %v2219_v52 }
 0x416   : > { %v2023_v54 = vpop.f32.mrf.mxu0  ;;  %v2109_v56 = vpop.f32.mrf.mxu1 }
 0x417   : > { %v2110_v60 = vadd.f32 %v2109_v56, %v2023_v54 }
 0x418   : > { %v2509_v57 = vpop.f32.mrf.mxu0  ;;  %v2516_v58 = vpop.f32.mrf.mxu1 }
 0x41b   : > { %v2198_v63 = vpop.f32.mrf.mxu0  ;;  %v2288_v61 = vpop.f32.mrf.mxu1 }
 0x41c   : > { %v2202_v1 = vadd.f32 %v2198_v63, %v2110_v60 }
 0x41d   : > { %v2523_v8 = vpop.f32.mrf.mxu0  ;;  %v2530_v9 = vpop.f32.mrf.mxu1 }
 0x41e   : > { %v2292_v10 = vadd.f32 %v2288_v61, %v2202_v1 }
 0x420   : > { %v2300_v11 = vadd.f32 %v2431_v19, %v2292_v10 }
 0x422   : > { %2301 = vst.msk [vmem:[%s2892_s13] sm:$0xff] %vm1015_vm12, %v2300_v11 }
 0x423 PF: > { %s20_s8 = sadd.s32 1, %s2740_s8   ;;  %s3412_s20 = sld [smem:[#allocation8_spill]] }
 0x424   : > { %p17_p11 = scmp.ge.s32.totalorder %s20_s8, 6   ;;  %s3413_s24 = smov %s2716_s25 }
 0x425   : > { %s3414_s25 = smov %s2720_s26  ;;  %s3415_s26 = smov %s2860_s21 }
 0x426   : > { %s3416_s27 = smov %s2732_s29  ;;  %s3417_s28 = smov %s2736_s30 }
 0x427   : > { %s3419_s30 = smov %s3425_s11  ;;  %19 = sbr.rel (!%p17_p11) target bundleno = 9 (0x9), region = 99 }
 0x429   : > { %s3418_s29 = smov %s3412_s20 }
 0x42c   :  { %2321 = vsyncpa [#allocation6], 1 }
 0x42d   :  { %2323 = vsyncpa [#allocation6 + $0x1], 1 }

</bundles_post_ra>
